<compile_context>
chip_gen: v7x
topology: tpu7x:2x2x1
jax: 0.10.0
libtpu: 0.0.40
codegen_flags: <defaults>
</compile_context>

<pallas_src>
import functools

import jax
import jax.numpy as jnp
from jax import lax
from jax.experimental import pallas as pl
from jax.experimental.pallas import tpu as pltpu


# ----------------------------------------------------------------------------
# Helpers
# ----------------------------------------------------------------------------
def _round_up(v, m):
    return -(-v // m) * m


def _fold_bn(gamma, beta, mean, var, eps):
    scale = gamma / jnp.sqrt(var + eps)
    bias = beta - mean * scale
    return scale, bias


def _swish(y, approx):
    if approx:
        # exp and the approximate reciprocal both issue on the (otherwise idle)
        # EUP slot, keeping the divide off the VPU critical path.
        return y * pl.reciprocal(1.0 + jnp.exp(-y), approx=True)
    return y * jax.nn.sigmoid(y)


def _pick_cexp_chunk(cexp, hw, budget_bytes=4 << 20):
    """Largest cexp chunk (multiple of 8) whose depthwise working set
    (activation + accumulator + one rolled tap, f32) fits the budget."""
    hw_p = _round_up(hw, 128)
    per_chan = 3 * 4 * hw_p
    max_c = max(8, budget_bytes // per_chan)
    return int(min(cexp, max(8, (max_c // 8) * 8)))


# ----------------------------------------------------------------------------
# Fused MBConv kernel: one grid step == one image, layout (channels, H*W)
# ----------------------------------------------------------------------------
def _mbconv_kernel(x_ref, *refs, k, pad, H, W, cin, cexp, cout, chunk,
                   has_expand, use_skip, compute_dtype, approx_swish):
    if has_expand:
        (w0_ref, s0_ref, b0_ref, wdw_ref, s1_ref, b1_ref,
         w2_ref, s2_ref, b2_ref, o_ref) = refs
    else:
        (wdw_ref, s1_ref, b1_ref, w2_ref, s2_ref, b2_ref, o_ref) = refs

    HW = H * W
    xin = x_ref[0, :, :].astype(jnp.float32)           # (cin, HW), lane-dense

    # ---- 'same'-padding boundary masks for the k*k depthwise taps ----------
    lane = lax.broadcasted_iota(jnp.int32, (1, HW), 1)
    if W & (W - 1) == 0:
        col = lane & (W - 1)
    else:
        col = lax.rem(lane, W)

    taps = []
    for ky in range(k):
        for kx in range(k):
            dy, dx = ky - pad, kx - pad
            conds = []
            if dy < 0:
                conds.append(lane >= (-dy) * W)
            elif dy > 0:
                conds.append(lane < (H - dy) * W)
            if dx < 0:
                conds.append(col >= -dx)
            elif dx > 0:
                conds.append(col < W - dx)
            mask = None
            for c in conds:
                mask = c if mask is None else (mask & c)
            shift = (-(dy * W + dx)) % HW            # out[i] = y[i + dy*W + dx]
            taps.append((ky * k + kx, shift, mask))

    acc_out = jnp.zeros((cout, HW), jnp.float32)

    # ---- static loop over cexp chunks bounds the live vreg/VMEM footprint --
    # TODO(synk): for very large spatial maps (H*W >> 128*1024 lanes) a row-
    # strip grid axis with halo handling would be needed on top of this.
    for cs in range(0, cexp, chunk):
        csize = min(chunk, cexp - cs)

        # -- expand 1x1 conv + folded BN + swish --
        if has_expand:
            w0c = w0_ref[cs:cs + csize, :]                      # (csize, cin)
            if cin <= 8:
                # tiny contraction: exact f32 outer-product FMAs on the VPU
                y = w0c[:, 0:1] * xin[0:1, :]
                for c in range(1, cin):
                    y = y + w0c[:, c:c + 1] * xin[c:c + 1, :]
            else:
                y = jnp.dot(w0c.astype(compute_dtype),
                            xin.astype(compute_dtype),
                            preferred_element_type=jnp.float32)
            y = y * s0_ref[cs:cs + csize, :] + b0_ref[cs:cs + csize, :]
            y = _swish(y, approx_swish)
        else:
            y = xin[cs:cs + csize, :]

        # -- depthwise kxk conv: XLU lane rolls + masks + per-channel FMAs --
        wdwc = wdw_ref[cs:cs + csize, :]                        # (csize, k*k)
        acc = jnp.zeros((csize, HW), jnp.float32)
        for t, shift, mask in taps:
            tap = y if shift == 0 else pltpu.roll(y, shift, axis=1)
            if mask is not None:
                tap = jnp.where(mask, tap, 0.0)
            acc = acc + tap * wdwc[:, t:t + 1]
        z = acc * s1_ref[cs:cs + csize, :] + b1_ref[cs:cs + csize, :]
        z = _swish(z, approx_swish)

        # -- project 1x1 conv: partial contribution of this cexp chunk --
        acc_out = acc_out + jnp.dot(
            w2_ref[:, cs:cs + csize].astype(compute_dtype),
            z.astype(compute_dtype),
            preferred_element_type=jnp.float32)

    out = acc_out * s2_ref[...] + b2_ref[...]
    if use_skip:
        out = out + xin
    # lane-dense NCHW store: last dim == H*W (multiple of 128 for typical maps)
    o_ref[0, :, :] = out.astype(o_ref.dtype)


# ----------------------------------------------------------------------------
# Wrapper
# ----------------------------------------------------------------------------
def mbconv_forward(x_nchw, params, block_args, *, bn_eps=1e-3, dilation=1,
                   drop_connect_rate=None, compute_dtype=jnp.bfloat16,
                   approx_swish=True, cexp_chunk=None):
    """Pallas implementation of MBConvBlock.forward (inference-mode BN)."""
    inp = block_args["input_filters"]
    expand_ratio = block_args["expand_ratio"]
    cexp = inp * expand_ratio
    cout = block_args["output_filters"]
    k = block_args["kernel_size"]
    s = block_args["stride"]

    # TODO(synk): stride>1 / dilation>1 depthwise and training-mode
    # drop_connect (stochastic depth) are not implemented; the SE branch is
    # never applied by this forward() (matches the PyTorch module's forward).
    assert s == 1 and dilation == 1
    del drop_connect_rate   # inference drop_connect == identity; skip still added

    N, C, H, W = x_nchw.shape
    assert C == inp
    pad = (k - 1) // 2
    HW = H * W

    has_expand = expand_ratio != 1
    use_skip = bool(block_args["id_skip"]) and s == 1 and inp == cout

    chunk = int(cexp_chunk) if cexp_chunk else _pick_cexp_chunk(cexp, HW)
    chunk = max(1, min(chunk, cexp))

    # Free, lane-dense view of the NCHW input: channels on sublanes, H*W on lanes.
    x_flat = x_nchw.reshape(N, C, HW)

    in_specs = [pl.BlockSpec((1, inp, HW), lambda n: (n, 0, 0))]
    args = [x_flat]
    if has_expand:
        w0 = params["w_expand"][:, :, 0, 0]                         # (cexp, cin)
        s0, b0 = _fold_bn(params["bn0_gamma"], params["bn0_beta"],
                          params["bn0_mean"], params["bn0_var"], bn_eps)
        in_specs += [pl.BlockSpec((cexp, inp), lambda n: (0, 0)),
                     pl.BlockSpec((cexp, 1), lambda n: (0, 0)),
                     pl.BlockSpec((cexp, 1), lambda n: (0, 0))]
        args += [w0, s0[:, None], b0[:, None]]

    wdw = params["w_dw"][:, 0, :, :].reshape(cexp, k * k)           # (cexp, k*k)
    s1, b1 = _fold_bn(params["bn1_gamma"], params["bn1_beta"],
                      params["bn1_mean"], params["bn1_var"], bn_eps)
    w2 = params["w_project"][:, :, 0, 0]                            # (cout, cexp)
    s2, b2 = _fold_bn(params["bn2_gamma"], params["bn2_beta"],
                      params["bn2_mean"], params["bn2_var"], bn_eps)
    in_specs += [pl.BlockSpec((cexp, k * k), lambda n: (0, 0)),
                 pl.BlockSpec((cexp, 1), lambda n: (0, 0)),
                 pl.BlockSpec((cexp, 1), lambda n: (0, 0)),
                 pl.BlockSpec((cout, cexp), lambda n: (0, 0)),
                 pl.BlockSpec((cout, 1), lambda n: (0, 0)),
                 pl.BlockSpec((cout, 1), lambda n: (0, 0))]
    args += [wdw, s1[:, None], b1[:, None], w2, s2[:, None], b2[:, None]]

    kernel = functools.partial(
        _mbconv_kernel, k=k, pad=pad, H=H, W=W, cin=inp, cexp=cexp, cout=cout,
        chunk=chunk, has_expand=has_expand, use_skip=use_skip,
        compute_dtype=compute_dtype, approx_swish=approx_swish)

    # ---- generation-aware VMEM ask (v7x has 64 MiB/TC vs 128 on v5e/v6e) ----
    hw_p = _round_up(HW, 128)
    cin_p, cexp_p, cout_p, chunk_p = (_round_up(c, 8)
                                      for c in (inp, cexp, cout, chunk))
    blocks = 2 * cin_p * hw_p + 2 * cout_p * hw_p           # double-buffered I/O
    temps = (3 * chunk_p + cout_p + cin_p + 8) * hw_p       # in-kernel live values
    wts = cexp_p * 128 * 7 + cout_p * 128 * 3 + cexp_p * _round_up(inp, 128)
    need_bytes = 4 * (blocks + temps + wts)
    try:
        vmem_cap = int(pltpu.get_tpu_info().vmem_capacity_bytes)
    except Exception:
        vmem_cap = 64 * 1024 * 1024
    vmem_limit = int(min(max(2 * need_bytes, 32 * 1024 * 1024),
                         int(vmem_cap * 0.75)))

    # ---- cost estimate so XLA schedules neighbours around the call ----------
    flops_img = (2 * HW * k * k * cexp + 2 * HW * cexp * cout + 8 * HW * cexp
                 + (2 * HW * inp * cexp if has_expand else 0))
    transc_img = (2 if has_expand else 1) * HW * cexp
    param_bytes = 4 * (cexp * inp + cexp * k * k + cexp * cout
                       + 4 * cexp + 2 * cout)
    cost = pl.CostEstimate(flops=N * flops_img,
                           transcendentals=N * transc_img,
                           bytes_accessed=N * 4 * (inp + cout) * HW + param_bytes)

    out = pl.pallas_call(
        kernel,
        out_shape=jax.ShapeDtypeStruct((N, cout, HW), x_nchw.dtype),
        grid=(N,),
        in_specs=in_specs,
        out_specs=pl.BlockSpec((1, cout, HW), lambda n: (n, 0, 0)),
        compiler_params=pltpu.CompilerParams(
            dimension_semantics=("parallel",),     # images split across TCs (v7x)
            vmem_limit_bytes=vmem_limit),
        cost_estimate=cost,
    )(*args)

    return out.reshape(N, cout, H, W)     # free reshape; already NCHW


# ----------------------------------------------------------------------------
# Pure-JAX reference (mirrors the PyTorch NCHW semantics) for validation
# ----------------------------------------------------------------------------
def _bn_ref(y, gamma, beta, mean, var, eps):
    inv = gamma / jnp.sqrt(var + eps)
    return (y - mean[None, :, None, None]) * inv[None, :, None, None] \
        + beta[None, :, None, None]


def mbconv_ref(x, params, block_args, *, bn_eps=1e-3):
    dn = ("NCHW", "OIHW", "NCHW")
    k = block_args["kernel_size"]
    pad = (k - 1) // 2
    oup_exp = block_args["input_filters"] * block_args["expand_ratio"]

    y = lax.conv_general_dilated(x, params["w_expand"], (1, 1), "VALID",
                                 dimension_numbers=dn,
                                 precision=lax.Precision.HIGHEST)
    y = _bn_ref(y, params["bn0_gamma"], params["bn0_beta"],
                params["bn0_mean"], params["bn0_var"], bn_eps)
    y = y * jax.nn.sigmoid(y)

    y = lax.conv_general_dilated(y, params["w_dw"],
                                 (block_args["stride"], block_args["stride"]),
                                 [(pad, pad), (pad, pad)],
                                 dimension_numbers=dn,
                                 feature_group_count=oup_exp,
                                 precision=lax.Precision.HIGHEST)
    y = _bn_ref(y, params["bn1_gamma"], params["bn1_beta"],
                params["bn1_mean"], params["bn1_var"], bn_eps)
    y = y * jax.nn.sigmoid(y)

    y = lax.conv_general_dilated(y, params["w_project"], (1, 1), "VALID",
                                 dimension_numbers=dn,
                                 precision=lax.Precision.HIGHEST)
    y = _bn_ref(y, params["bn2_gamma"], params["bn2_beta"],
                params["bn2_mean"], params["bn2_var"], bn_eps)
    if (block_args["id_skip"] and block_args["stride"] == 1
            and block_args["input_filters"] == block_args["output_filters"]):
        y = y + x
    return y


# ----------------------------------------------------------------------------
# Main
# ----------------------------------------------------------------------------
if __name__ == "__main__":
    block_args = dict(
        input_filters=4,
        output_filters=4,
        expand_ratio=6,
        kernel_size=3,
        stride=1,
        id_skip=True,
        se_ratio=0.25,   # NOTE: this forward() never applies SE, only sets has_se
    )
    bn_eps = 1e-3
    inp = block_args["input_filters"]
    cexp = inp * block_args["expand_ratio"]
    cout = block_args["output_filters"]
    k = block_args["kernel_size"]

    key = jax.random.PRNGKey(0)
    keys = jax.random.split(key, 16)

    def bn_params(k1, k2, k3, k4, c):
        return (1.0 + 0.1 * jax.random.normal(k1, (c,), jnp.float32),   # gamma
                0.05 * jax.random.normal(k2, (c,), jnp.float32),        # beta
                0.1 * jax.random.normal(k3, (c,), jnp.float32),         # running_mean
                jax.random.uniform(k4, (c,), jnp.float32, 0.5, 1.5))    # running_var

    g0, b0, m0, v0 = bn_params(keys[1], keys[2], keys[3], keys[4], cexp)
    g1, b1, m1, v1 = bn_params(keys[6], keys[7], keys[8], keys[9], cexp)
    g2, b2, m2, v2 = bn_params(keys[11], keys[12], keys[13], keys[14], cout)

    params = dict(
        w_expand=0.2 * jax.random.normal(keys[0], (cexp, inp, 1, 1), jnp.float32),
        bn0_gamma=g0, bn0_beta=b0, bn0_mean=m0, bn0_var=v0,
        w_dw=0.2 * jax.random.normal(keys[5], (cexp, 1, k, k), jnp.float32),
        bn1_gamma=g1, bn1_beta=b1, bn1_mean=m1, bn1_var=v1,
        w_project=0.2 * jax.random.normal(keys[10], (cout, cexp, 1, 1), jnp.float32),
        bn2_gamma=g2, bn2_beta=b2, bn2_mean=m2, bn2_var=v2,
    )

    x = jax.random.normal(keys[15], (2, 4, 16, 16), jnp.float32)   # NCHW input

    ref = jax.block_until_ready(mbconv_ref(x, params, block_args, bn_eps=bn_eps))

    # Default fast path: bf16 MXU operands + EUP approx swish, single cexp chunk.
    out = jax.block_until_ready(mbconv_forward(x, params, block_args, bn_eps=bn_eps))
    assert out.shape == ref.shape == (2, 4, 16, 16)
    assert jnp.allclose(out, ref, atol=2e-2, rtol=2e-2), \
        float(jnp.max(jnp.abs(out - ref)))

    # Strict path: exact sigmoid + f32 matmuls, forced multi-chunk cexp loop
    # (exercises the chunked accumulation used for production-sized cexp).
    out_strict = jax.block_until_ready(
        mbconv_forward(x, params, block_args, bn_eps=bn_eps,
                       compute_dtype=jnp.float32, approx_swish=False,
                       cexp_chunk=8))
    assert jnp.allclose(out_strict, ref, atol=2e-3, rtol=2e-3), \
        float(jnp.max(jnp.abs(out_strict - ref)))

    print("KERNEL_OK")
</pallas_src>

<mosaic_0001>
module attributes {stable_mosaic.version = 11 : i64} {
  func.func @_mbconv_kernel(%arg0: i32, %arg1: memref<1x4x256xf32, #tpu.memory_space<vmem>>, %arg2: memref<24x4xf32, #tpu.memory_space<vmem>>, %arg3: memref<24x1xf32, #tpu.memory_space<vmem>>, %arg4: memref<24x1xf32, #tpu.memory_space<vmem>>, %arg5: memref<24x9xf32, #tpu.memory_space<vmem>>, %arg6: memref<24x1xf32, #tpu.memory_space<vmem>>, %arg7: memref<24x1xf32, #tpu.memory_space<vmem>>, %arg8: memref<4x24xf32, #tpu.memory_space<vmem>>, %arg9: memref<4x1xf32, #tpu.memory_space<vmem>>, %arg10: memref<4x1xf32, #tpu.memory_space<vmem>>, %arg11: memref<1x4x256xf32, #tpu.memory_space<vmem>>) attributes {dimension_semantics = [#tpu.dimension_semantics<parallel>], iteration_bounds = array<i64: 2>, scalar_prefetch = 0 : i64, scratch_operands = 0 : i64, tpu.core_type = #tpu.core_type<tc>, window_params = [{transform_indices = @transform_0, window_bounds = array<i64: 1, 4, 256>}, {pipeline_mode = #tpu.pipeline_mode<synchronous>, transform_indices = @transform_1, window_bounds = array<i64: 24, 4>}, {pipeline_mode = #tpu.pipeline_mode<synchronous>, transform_indices = @transform_2, window_bounds = array<i64: 24, 1>}, {pipeline_mode = #tpu.pipeline_mode<synchronous>, transform_indices = @transform_3, window_bounds = array<i64: 24, 1>}, {pipeline_mode = #tpu.pipeline_mode<synchronous>, transform_indices = @transform_4, window_bounds = array<i64: 24, 9>}, {pipeline_mode = #tpu.pipeline_mode<synchronous>, transform_indices = @transform_5, window_bounds = array<i64: 24, 1>}, {pipeline_mode = #tpu.pipeline_mode<synchronous>, transform_indices = @transform_6, window_bounds = array<i64: 24, 1>}, {pipeline_mode = #tpu.pipeline_mode<synchronous>, transform_indices = @transform_7, window_bounds = array<i64: 4, 24>}, {pipeline_mode = #tpu.pipeline_mode<synchronous>, transform_indices = @transform_8, window_bounds = array<i64: 4, 1>}, {pipeline_mode = #tpu.pipeline_mode<synchronous>, transform_indices = @transform_9, window_bounds = array<i64: 4, 1>}, {transform_indices = @transform_10, window_bounds = array<i64: 1, 4, 256>}]} {
    %c0 = arith.constant 0 : index
    %c0_0 = arith.constant 0 : index
    %c0_1 = arith.constant 0 : index
    %0 = vector.load %arg1[%c0, %c0_0, %c0_1] : memref<1x4x256xf32, #tpu.memory_space<vmem>>, vector<1x4x256xf32>
    %1 = vector.shape_cast %0 : vector<1x4x256xf32> to vector<4x256xf32>
    %2 = tpu.iota {dimensions = array<i32: 1>} : vector<1x256xi32>
    %c15_i32 = arith.constant 15 : i32
    %3 = vector.broadcast %c15_i32 : i32 to vector<1x256xi32>
    %4 = arith.andi %2, %3 : vector<1x256xi32>
    %c16_i32 = arith.constant 16 : i32
    %5 = vector.broadcast %c16_i32 : i32 to vector<1x256xi32>
    %6 = arith.cmpi sge, %2, %5 : vector<1x256xi32>
    %c1_i32 = arith.constant 1 : i32
    %7 = vector.broadcast %c1_i32 : i32 to vector<1x256xi32>
    %8 = arith.cmpi sge, %4, %7 : vector<1x256xi32>
    %9 = arith.andi %6, %8 : vector<1x256xi1>
    %c16_i32_2 = arith.constant 16 : i32
    %10 = vector.broadcast %c16_i32_2 : i32 to vector<1x256xi32>
    %11 = arith.cmpi sge, %2, %10 : vector<1x256xi32>
    %c16_i32_3 = arith.constant 16 : i32
    %12 = vector.broadcast %c16_i32_3 : i32 to vector<1x256xi32>
    %13 = arith.cmpi sge, %2, %12 : vector<1x256xi32>
    %c15_i32_4 = arith.constant 15 : i32
    %14 = vector.broadcast %c15_i32_4 : i32 to vector<1x256xi32>
    %15 = arith.cmpi slt, %4, %14 : vector<1x256xi32>
    %16 = arith.andi %13, %15 : vector<1x256xi1>
    %c1_i32_5 = arith.constant 1 : i32
    %17 = vector.broadcast %c1_i32_5 : i32 to vector<1x256xi32>
    %18 = arith.cmpi sge, %4, %17 : vector<1x256xi32>
    %c15_i32_6 = arith.constant 15 : i32
    %19 = vector.broadcast %c15_i32_6 : i32 to vector<1x256xi32>
    %20 = arith.cmpi slt, %4, %19 : vector<1x256xi32>
    %c240_i32 = arith.constant 240 : i32
    %21 = vector.broadcast %c240_i32 : i32 to vector<1x256xi32>
    %22 = arith.cmpi slt, %2, %21 : vector<1x256xi32>
    %c1_i32_7 = arith.constant 1 : i32
    %23 = vector.broadcast %c1_i32_7 : i32 to vector<1x256xi32>
    %24 = arith.cmpi sge, %4, %23 : vector<1x256xi32>
    %25 = arith.andi %22, %24 : vector<1x256xi1>
    %c240_i32_8 = arith.constant 240 : i32
    %26 = vector.broadcast %c240_i32_8 : i32 to vector<1x256xi32>
    %27 = arith.cmpi slt, %2, %26 : vector<1x256xi32>
    %c240_i32_9 = arith.constant 240 : i32
    %28 = vector.broadcast %c240_i32_9 : i32 to vector<1x256xi32>
    %29 = arith.cmpi slt, %2, %28 : vector<1x256xi32>
    %c15_i32_10 = arith.constant 15 : i32
    %30 = vector.broadcast %c15_i32_10 : i32 to vector<1x256xi32>
    %31 = arith.cmpi slt, %4, %30 : vector<1x256xi32>
    %32 = arith.andi %29, %31 : vector<1x256xi1>
    %cst = arith.constant 0.000000e+00 : f32
    %33 = vector.broadcast %cst : f32 to vector<4x256xf32>
    %c0_11 = arith.constant 0 : index
    %c0_12 = arith.constant 0 : index
    %34 = vector.load %arg2[%c0_11, %c0_12] : memref<24x4xf32, #tpu.memory_space<vmem>>, vector<24x4xf32>
    %35 = vector.extract_strided_slice %34 {offsets = [0, 0], sizes = [24, 1], strides = [1, 1]} : vector<24x4xf32> to vector<24x1xf32>
    %36 = vector.extract_strided_slice %1 {offsets = [0, 0], sizes = [1, 256], strides = [1, 1]} : vector<4x256xf32> to vector<1x256xf32>
    %37 = vector.broadcast %35 : vector<24x1xf32> to vector<24x256xf32>
    %38 = vector.broadcast %36 : vector<1x256xf32> to vector<24x256xf32>
    %39 = arith.mulf %37, %38 : vector<24x256xf32>
    %40 = vector.extract_strided_slice %34 {offsets = [0, 1], sizes = [24, 1], strides = [1, 1]} : vector<24x4xf32> to vector<24x1xf32>
    %41 = vector.extract_strided_slice %1 {offsets = [1, 0], sizes = [1, 256], strides = [1, 1]} : vector<4x256xf32> to vector<1x256xf32>
    %42 = vector.broadcast %40 : vector<24x1xf32> to vector<24x256xf32>
    %43 = vector.broadcast %41 : vector<1x256xf32> to vector<24x256xf32>
    %44 = arith.mulf %42, %43 : vector<24x256xf32>
    %45 = arith.addf %39, %44 : vector<24x256xf32>
    %46 = vector.extract_strided_slice %34 {offsets = [0, 2], sizes = [24, 1], strides = [1, 1]} : vector<24x4xf32> to vector<24x1xf32>
    %47 = vector.extract_strided_slice %1 {offsets = [2, 0], sizes = [1, 256], strides = [1, 1]} : vector<4x256xf32> to vector<1x256xf32>
    %48 = vector.broadcast %46 : vector<24x1xf32> to vector<24x256xf32>
    %49 = vector.broadcast %47 : vector<1x256xf32> to vector<24x256xf32>
    %50 = arith.mulf %48, %49 : vector<24x256xf32>
    %51 = arith.addf %45, %50 : vector<24x256xf32>
    %52 = vector.extract_strided_slice %34 {offsets = [0, 3], sizes = [24, 1], strides = [1, 1]} : vector<24x4xf32> to vector<24x1xf32>
    %53 = vector.extract_strided_slice %1 {offsets = [3, 0], sizes = [1, 256], strides = [1, 1]} : vector<4x256xf32> to vector<1x256xf32>
    %54 = vector.broadcast %52 : vector<24x1xf32> to vector<24x256xf32>
    %55 = vector.broadcast %53 : vector<1x256xf32> to vector<24x256xf32>
    %56 = arith.mulf %54, %55 : vector<24x256xf32>
    %57 = arith.addf %51, %56 : vector<24x256xf32>
    %c0_13 = arith.constant 0 : index
    %c0_14 = arith.constant 0 : index
    %58 = vector.load %arg3[%c0_13, %c0_14] : memref<24x1xf32, #tpu.memory_space<vmem>>, vector<24x1xf32>
    %59 = vector.broadcast %58 : vector<24x1xf32> to vector<24x256xf32>
    %60 = arith.mulf %57, %59 : vector<24x256xf32>
    %c0_15 = arith.constant 0 : index
    %c0_16 = arith.constant 0 : index
    %61 = vector.load %arg4[%c0_15, %c0_16] : memref<24x1xf32, #tpu.memory_space<vmem>>, vector<24x1xf32>
    %62 = vector.broadcast %61 : vector<24x1xf32> to vector<24x256xf32>
    %63 = arith.addf %60, %62 : vector<24x256xf32>
    %cst_17 = arith.constant 0.000000e+00 : f32
    %64 = vector.broadcast %cst_17 : f32 to vector<24x256xf32>
    %65 = arith.subf %64, %63 : vector<24x256xf32>
    %66 = math.exp %65 : vector<24x256xf32>
    %cst_18 = arith.constant 1.000000e+00 : f32
    %67 = vector.broadcast %cst_18 : f32 to vector<24x256xf32>
    %68 = arith.addf %67, %66 : vector<24x256xf32>
    %69 = tpu.reciprocal %68 {approx = true} : vector<24x256xf32> -> vector<24x256xf32>
    %70 = arith.mulf %63, %69 : vector<24x256xf32>
    %c0_19 = arith.constant 0 : index
    %c0_20 = arith.constant 0 : index
    %71 = vector.load %arg5[%c0_19, %c0_20] : memref<24x9xf32, #tpu.memory_space<vmem>>, vector<24x9xf32>
    %cst_21 = arith.constant 0.000000e+00 : f32
    %72 = vector.broadcast %cst_21 : f32 to vector<24x256xf32>
    %c17_i32 = arith.constant 17 : i32
    %73 = tpu.dynamic_rotate %70 by %c17_i32 dim 1 : vector<24x256xf32>, i32 -> vector<24x256xf32>
    %cst_22 = arith.constant 0.000000e+00 : f32
    %74 = vector.shape_cast %9 : vector<1x256xi1> to vector<1x256xi1>
    %75 = vector.broadcast %74 : vector<1x256xi1> to vector<24x256xi1>
    %76 = vector.broadcast %cst_22 : f32 to vector<24x256xf32>
    %77 = arith.select %75, %73, %76 : vector<24x256xi1>, vector<24x256xf32>
    %78 = vector.extract_strided_slice %71 {offsets = [0, 0], sizes = [24, 1], strides = [1, 1]} : vector<24x9xf32> to vector<24x1xf32>
    %79 = vector.broadcast %78 : vector<24x1xf32> to vector<24x256xf32>
    %80 = arith.mulf %77, %79 : vector<24x256xf32>
    %81 = arith.addf %72, %80 : vector<24x256xf32>
    %c16_i32_23 = arith.constant 16 : i32
    %82 = tpu.dynamic_rotate %70 by %c16_i32_23 dim 1 : vector<24x256xf32>, i32 -> vector<24x256xf32>
    %cst_24 = arith.constant 0.000000e+00 : f32
    %83 = vector.shape_cast %11 : vector<1x256xi1> to vector<1x256xi1>
    %84 = vector.broadcast %83 : vector<1x256xi1> to vector<24x256xi1>
    %85 = vector.broadcast %cst_24 : f32 to vector<24x256xf32>
    %86 = arith.select %84, %82, %85 : vector<24x256xi1>, vector<24x256xf32>
    %87 = vector.extract_strided_slice %71 {offsets = [0, 1], sizes = [24, 1], strides = [1, 1]} : vector<24x9xf32> to vector<24x1xf32>
    %88 = vector.broadcast %87 : vector<24x1xf32> to vector<24x256xf32>
    %89 = arith.mulf %86, %88 : vector<24x256xf32>
    %90 = arith.addf %81, %89 : vector<24x256xf32>
    %c15_i32_25 = arith.constant 15 : i32
    %91 = tpu.dynamic_rotate %70 by %c15_i32_25 dim 1 : vector<24x256xf32>, i32 -> vector<24x256xf32>
    %cst_26 = arith.constant 0.000000e+00 : f32
    %92 = vector.shape_cast %16 : vector<1x256xi1> to vector<1x256xi1>
    %93 = vector.broadcast %92 : vector<1x256xi1> to vector<24x256xi1>
    %94 = vector.broadcast %cst_26 : f32 to vector<24x256xf32>
    %95 = arith.select %93, %91, %94 : vector<24x256xi1>, vector<24x256xf32>
    %96 = vector.extract_strided_slice %71 {offsets = [0, 2], sizes = [24, 1], strides = [1, 1]} : vector<24x9xf32> to vector<24x1xf32>
    %97 = vector.broadcast %96 : vector<24x1xf32> to vector<24x256xf32>
    %98 = arith.mulf %95, %97 : vector<24x256xf32>
    %99 = arith.addf %90, %98 : vector<24x256xf32>
    %c1_i32_27 = arith.constant 1 : i32
    %100 = tpu.dynamic_rotate %70 by %c1_i32_27 dim 1 : vector<24x256xf32>, i32 -> vector<24x256xf32>
    %cst_28 = arith.constant 0.000000e+00 : f32
    %101 = vector.shape_cast %18 : vector<1x256xi1> to vector<1x256xi1>
    %102 = vector.broadcast %101 : vector<1x256xi1> to vector<24x256xi1>
    %103 = vector.broadcast %cst_28 : f32 to vector<24x256xf32>
    %104 = arith.select %102, %100, %103 : vector<24x256xi1>, vector<24x256xf32>
    %105 = vector.extract_strided_slice %71 {offsets = [0, 3], sizes = [24, 1], strides = [1, 1]} : vector<24x9xf32> to vector<24x1xf32>
    %106 = vector.broadcast %105 : vector<24x1xf32> to vector<24x256xf32>
    %107 = arith.mulf %104, %106 : vector<24x256xf32>
    %108 = arith.addf %99, %107 : vector<24x256xf32>
    %109 = vector.extract_strided_slice %71 {offsets = [0, 4], sizes = [24, 1], strides = [1, 1]} : vector<24x9xf32> to vector<24x1xf32>
    %110 = vector.broadcast %109 : vector<24x1xf32> to vector<24x256xf32>
    %111 = arith.mulf %70, %110 : vector<24x256xf32>
    %112 = arith.addf %108, %111 : vector<24x256xf32>
    %c255_i32 = arith.constant 255 : i32
    %113 = tpu.dynamic_rotate %70 by %c255_i32 dim 1 : vector<24x256xf32>, i32 -> vector<24x256xf32>
    %cst_29 = arith.constant 0.000000e+00 : f32
    %114 = vector.shape_cast %20 : vector<1x256xi1> to vector<1x256xi1>
    %115 = vector.broadcast %114 : vector<1x256xi1> to vector<24x256xi1>
    %116 = vector.broadcast %cst_29 : f32 to vector<24x256xf32>
    %117 = arith.select %115, %113, %116 : vector<24x256xi1>, vector<24x256xf32>
    %118 = vector.extract_strided_slice %71 {offsets = [0, 5], sizes = [24, 1], strides = [1, 1]} : vector<24x9xf32> to vector<24x1xf32>
    %119 = vector.broadcast %118 : vector<24x1xf32> to vector<24x256xf32>
    %120 = arith.mulf %117, %119 : vector<24x256xf32>
    %121 = arith.addf %112, %120 : vector<24x256xf32>
    %c241_i32 = arith.constant 241 : i32
    %122 = tpu.dynamic_rotate %70 by %c241_i32 dim 1 : vector<24x256xf32>, i32 -> vector<24x256xf32>
    %cst_30 = arith.constant 0.000000e+00 : f32
    %123 = vector.shape_cast %25 : vector<1x256xi1> to vector<1x256xi1>
    %124 = vector.broadcast %123 : vector<1x256xi1> to vector<24x256xi1>
    %125 = vector.broadcast %cst_30 : f32 to vector<24x256xf32>
    %126 = arith.select %124, %122, %125 : vector<24x256xi1>, vector<24x256xf32>
    %127 = vector.extract_strided_slice %71 {offsets = [0, 6], sizes = [24, 1], strides = [1, 1]} : vector<24x9xf32> to vector<24x1xf32>
    %128 = vector.broadcast %127 : vector<24x1xf32> to vector<24x256xf32>
    %129 = arith.mulf %126, %128 : vector<24x256xf32>
    %130 = arith.addf %121, %129 : vector<24x256xf32>
    %c240_i32_31 = arith.constant 240 : i32
    %131 = tpu.dynamic_rotate %70 by %c240_i32_31 dim 1 : vector<24x256xf32>, i32 -> vector<24x256xf32>
    %cst_32 = arith.constant 0.000000e+00 : f32
    %132 = vector.shape_cast %27 : vector<1x256xi1> to vector<1x256xi1>
    %133 = vector.broadcast %132 : vector<1x256xi1> to vector<24x256xi1>
    %134 = vector.broadcast %cst_32 : f32 to vector<24x256xf32>
    %135 = arith.select %133, %131, %134 : vector<24x256xi1>, vector<24x256xf32>
    %136 = vector.extract_strided_slice %71 {offsets = [0, 7], sizes = [24, 1], strides = [1, 1]} : vector<24x9xf32> to vector<24x1xf32>
    %137 = vector.broadcast %136 : vector<24x1xf32> to vector<24x256xf32>
    %138 = arith.mulf %135, %137 : vector<24x256xf32>
    %139 = arith.addf %130, %138 : vector<24x256xf32>
    %c239_i32 = arith.constant 239 : i32
    %140 = tpu.dynamic_rotate %70 by %c239_i32 dim 1 : vector<24x256xf32>, i32 -> vector<24x256xf32>
    %cst_33 = arith.constant 0.000000e+00 : f32
    %141 = vector.shape_cast %32 : vector<1x256xi1> to vector<1x256xi1>
    %142 = vector.broadcast %141 : vector<1x256xi1> to vector<24x256xi1>
    %143 = vector.broadcast %cst_33 : f32 to vector<24x256xf32>
    %144 = arith.select %142, %140, %143 : vector<24x256xi1>, vector<24x256xf32>
    %145 = vector.extract_strided_slice %71 {offsets = [0, 8], sizes = [24, 1], strides = [1, 1]} : vector<24x9xf32> to vector<24x1xf32>
    %146 = vector.broadcast %145 : vector<24x1xf32> to vector<24x256xf32>
    %147 = arith.mulf %144, %146 : vector<24x256xf32>
    %148 = arith.addf %139, %147 : vector<24x256xf32>
    %c0_34 = arith.constant 0 : index
    %c0_35 = arith.constant 0 : index
    %149 = vector.load %arg6[%c0_34, %c0_35] : memref<24x1xf32, #tpu.memory_space<vmem>>, vector<24x1xf32>
    %150 = vector.broadcast %149 : vector<24x1xf32> to vector<24x256xf32>
    %151 = arith.mulf %148, %150 : vector<24x256xf32>
    %c0_36 = arith.constant 0 : index
    %c0_37 = arith.constant 0 : index
    %152 = vector.load %arg7[%c0_36, %c0_37] : memref<24x1xf32, #tpu.memory_space<vmem>>, vector<24x1xf32>
    %153 = vector.broadcast %152 : vector<24x1xf32> to vector<24x256xf32>
    %154 = arith.addf %151, %153 : vector<24x256xf32>
    %cst_38 = arith.constant 0.000000e+00 : f32
    %155 = vector.broadcast %cst_38 : f32 to vector<24x256xf32>
    %156 = arith.subf %155, %154 : vector<24x256xf32>
    %157 = math.exp %156 : vector<24x256xf32>
    %cst_39 = arith.constant 1.000000e+00 : f32
    %158 = vector.broadcast %cst_39 : f32 to vector<24x256xf32>
    %159 = arith.addf %158, %157 : vector<24x256xf32>
    %160 = tpu.reciprocal %159 {approx = true} : vector<24x256xf32> -> vector<24x256xf32>
    %161 = arith.mulf %154, %160 : vector<24x256xf32>
    %c0_40 = arith.constant 0 : index
    %c0_41 = arith.constant 0 : index
    %162 = vector.load %arg8[%c0_40, %c0_41] : memref<4x24xf32, #tpu.memory_space<vmem>>, vector<4x24xf32>
    %163 = arith.truncf %162 : vector<4x24xf32> to vector<4x24xbf16>
    %164 = arith.truncf %161 : vector<24x256xf32> to vector<24x256xbf16>
    %cst_42 = arith.constant dense<0.000000e+00> : vector<4x256xf32>
    %165 = tpu.matmul %163, %164, %cst_42 {dimension_numbers = #tpu.dot_dimension_numbers<[1], [0], [0], [1], [0, 0, 1, 1], [], []>} : vector<4x24xbf16>, vector<24x256xbf16>, vector<4x256xf32> -> vector<4x256xf32>
    %166 = arith.addf %33, %165 : vector<4x256xf32>
    %c0_43 = arith.constant 0 : index
    %c0_44 = arith.constant 0 : index
    %167 = vector.load %arg9[%c0_43, %c0_44] : memref<4x1xf32, #tpu.memory_space<vmem>>, vector<4x1xf32>
    %168 = vector.broadcast %167 : vector<4x1xf32> to vector<4x256xf32>
    %169 = arith.mulf %166, %168 : vector<4x256xf32>
    %c0_45 = arith.constant 0 : index
    %c0_46 = arith.constant 0 : index
    %170 = vector.load %arg10[%c0_45, %c0_46] : memref<4x1xf32, #tpu.memory_space<vmem>>, vector<4x1xf32>
    %171 = vector.broadcast %170 : vector<4x1xf32> to vector<4x256xf32>
    %172 = arith.addf %169, %171 : vector<4x256xf32>
    %173 = arith.addf %172, %1 : vector<4x256xf32>
    %c0_47 = arith.constant 0 : index
    %c0_48 = arith.constant 0 : index
    %c0_49 = arith.constant 0 : index
    %174 = vector.load %arg11[%c0_47, %c0_48, %c0_49] : memref<1x4x256xf32, #tpu.memory_space<vmem>>, vector<1x4x256xf32>
    %175 = vector.shape_cast %174 : vector<1x4x256xf32> to vector<4x256xf32>
    %176 = vector.shape_cast %173 : vector<4x256xf32> to vector<1x4x256xf32>
    tpu.vector_store %arg11[%c0_47, %c0_48, %c0_49], %176 {strides = array<i32>} : memref<1x4x256xf32, #tpu.memory_space<vmem>>, vector<1x4x256xf32>,
    return
  }
  func.func @transform_0(%arg0: i32) -> (i32, i32, i32) {
    %c0_i32 = arith.constant 0 : i32
    %c0_i32_0 = arith.constant 0 : i32
    %c0_i32_1 = arith.constant 0 : i32
    return %arg0, %c0_i32, %c0_i32_0 : i32, i32, i32
  }
  func.func @transform_1(%arg0: i32) -> (i32, i32) {
    %c0_i32 = arith.constant 0 : i32
    %c0_i32_0 = arith.constant 0 : i32
    %c0_i32_1 = arith.constant 0 : i32
    return %c0_i32, %c0_i32_0 : i32, i32
  }
  func.func @transform_2(%arg0: i32) -> (i32, i32) {
    %c0_i32 = arith.constant 0 : i32
    %c0_i32_0 = arith.constant 0 : i32
    %c0_i32_1 = arith.constant 0 : i32
    return %c0_i32, %c0_i32_0 : i32, i32
  }
  func.func @transform_3(%arg0: i32) -> (i32, i32) {
    %c0_i32 = arith.constant 0 : i32
    %c0_i32_0 = arith.constant 0 : i32
    %c0_i32_1 = arith.constant 0 : i32
    return %c0_i32, %c0_i32_0 : i32, i32
  }
  func.func @transform_4(%arg0: i32) -> (i32, i32) {
    %c0_i32 = arith.constant 0 : i32
    %c0_i32_0 = arith.constant 0 : i32
    %c0_i32_1 = arith.constant 0 : i32
    return %c0_i32, %c0_i32_0 : i32, i32
  }
  func.func @transform_5(%arg0: i32) -> (i32, i32) {
    %c0_i32 = arith.constant 0 : i32
    %c0_i32_0 = arith.constant 0 : i32
    %c0_i32_1 = arith.constant 0 : i32
    return %c0_i32, %c0_i32_0 : i32, i32
  }
  func.func @transform_6(%arg0: i32) -> (i32, i32) {
    %c0_i32 = arith.constant 0 : i32
    %c0_i32_0 = arith.constant 0 : i32
    %c0_i32_1 = arith.constant 0 : i32
    return %c0_i32, %c0_i32_0 : i32, i32
  }
  func.func @transform_7(%arg0: i32) -> (i32, i32) {
    %c0_i32 = arith.constant 0 : i32
    %c0_i32_0 = arith.constant 0 : i32
    %c0_i32_1 = arith.constant 0 : i32
    return %c0_i32, %c0_i32_0 : i32, i32
  }
  func.func @transform_8(%arg0: i32) -> (i32, i32) {
    %c0_i32 = arith.constant 0 : i32
    %c0_i32_0 = arith.constant 0 : i32
    %c0_i32_1 = arith.constant 0 : i32
    return %c0_i32, %c0_i32_0 : i32, i32
  }
  func.func @transform_9(%arg0: i32) -> (i32, i32) {
    %c0_i32 = arith.constant 0 : i32
    %c0_i32_0 = arith.constant 0 : i32
    %c0_i32_1 = arith.constant 0 : i32
    return %c0_i32, %c0_i32_0 : i32, i32
  }
  func.func @transform_10(%arg0: i32) -> (i32, i32, i32) {
    %c0_i32 = arith.constant 0 : i32
    %c0_i32_0 = arith.constant 0 : i32
    %c0_i32_1 = arith.constant 0 : i32
    return %arg0, %c0_i32, %c0_i32_0 : i32, i32, i32
  }
}

</mosaic_0001>

<bundles_post_ra>
// kernel: tpu_custom_call.1
= control target key start
LH: loop header
LB: loop body
LE: loop exit
PB: predicated region body
PF: predicated region fallthrough
CT: control target
= control target key end

     0   :  { %15 = vsyncpa [#allocation3], 0  ;;  %s2351_s0 = inlined_call_operand.vmem [shape: f32[2,4,256], index: 0, kind: input, shape index: {}]   ;;  %s2352_s1 = inlined_call_operand.vmem [shape: f32[24,4], index: 1, kind: input, shape index: {}]   ;;  %s2353_s2 = inlined_call_operand.vmem [shape: f32[24,1], index: 2, kind: input, shape index: {}]   ;;  %s2354_s3 = inlined_call_operand.vmem [shape: f32[24,1], index: 3, kind: input, shape index: {}]   ;;  %s2355_s4 = inlined_call_operand.vmem [shape: f32[24,9], index: 4, kind: input, shape index: {}]   ;;  %s2356_s5 = inlined_call_operand.vmem [shape: f32[24,1], index: 5, kind: input, shape index: {}]   ;;  %s2357_s6 = inlined_call_operand.vmem [shape: f32[24,1], index: 6, kind: input, shape index: {}]   ;;  %s2358_s7 = inlined_call_operand.vmem [shape: f32[4,24], index: 7, kind: input, shape index: {}]   ;;  %s2359_s8 = inlined_call_operand.vmem [shape: f32[4,1], index: 8, kind: input, shape index: {}]   ;;  %s2360_s9 = inlined_call_operand.vmem [shape: f32[4,1], index: 9, kind: input, shape index: {}]   ;;  %s2361_s10 = inlined_call_operand.hbm [shape: f32[2,4,256], index: 10, kind: output, shape index: {}]  }
   0x1   :  { %17 = vsyncpa [#allocation3 + $0x1], 0  ;;  %s1620_s13 = smov 0   ;;  %s1622_s14 = smov 0  }
   0x2   :  { %s1624_s15 = smov 0   ;;  %s1626_s16 = smov 0  }
   0x3 LB: > { %s1641_s17 = sadd.s32 4294967295, %s1545_s16   ;;  %s1329_s18 = sadd.s32 4294967294, %s1545_s16   ;;  %s1545_s16 = sphi %s1626_s16, %s2383_s16   ;;  %s1541_s15 = sphi %s1624_s15, %s2382_s15   ;;  %s1537_s14 = sphi %s1622_s14, %s2381_s14   ;;  %s1533_s13 = sphi %s1620_s13, %s2380_s13  }
   0x4   : > { %s1645_s19 = sadd.s32 1, %s1545_s16   ;;  %s245_s20 = sadd.s32 1, %s1541_s15 }
   0x5   : > { %s242_s21 = ssub.s32 %s1545_s16, %s1645_s19  ;;  %p255_p0 = scmp.ne.s32.totalorder %s1541_s15, %s1537_s14 }
   0x6   : > { %p243_p1 = scmp.eq.s32.totalorder %s242_s21, 0  ;;  %p256_p2 = scmp.eq.s32.totalorder %s1641_s17, 1 }
   0x7   : > { %p261_p3 = scmp.ne.s32.totalorder %s1537_s14, %s1533_s13  ;;  %p262_p4 = scmp.eq.s32.totalorder %s1329_s18, 1 }
   0x8   : > { %s1656_s22 = scalar_select %p243_p1, %s1541_s15, %s245_s20  }
   0x9   : > { %p1658_p5 = por %p256_p2, %p255_p0  ;;  %p1662_p6 = por %p262_p4, %p261_p3 }
   0xa   : > { %p1332_p7 = scmp.ge.s32.totalorder %s1545_s16, 1  ;;  %p315_p8 = scmp.lt.s32.totalorder %s1545_s16, 3 }
   0xc   : > { %p316_p9 = pnand %p1332_p7, %p315_p8 }
   0xd   : > { %v381_v0 = vld [vmem:[%s2352_s1] sm:$0xff] (!%p316_p9)  ;;  %v1547_v1 = vmov (!%p316_p9), 1   ;;  %v1548_v2 = vmov (!%p316_p9), 0   ;;  %v382_v3 = vld [vmem:[%s2352_s1 + $0x8] sm:$0xff] (!%p316_p9)  ;;  %v1549_v5 = vmov (!%p316_p9), 2   ;;  %v552_v6 = vld [vmem:[%s2353_s2 + $0x10] sm:$0xff] (!%p316_p9)  ;;  %v360_v23 = vlaneseq (!%p316_p9) }
   0xe   : > { %319 = sbr.rel (%p316_p9) target bundleno = 734 (0x2de), region = 60  ;;  %1402 = vset.pattern.permute.xlu1 (!%p316_p9), %v1547_v1  ;;  %1401 = vset.pattern.permute.xlu0 (!%p316_p9), %v1548_v2  ;;  %v551_v4 = vld [vmem:[%s2353_s2 + $0x8] sm:$0xff] (!%p316_p9)  ;;  %v383_v7 = vld [vmem:[%s2352_s1 + $0x10] sm:$0xff] (!%p316_p9)  ;;  %v1550_v8 = vmov (!%p316_p9), 3   ;;  %v1691_v9 = vld [vmem:[%s2355_s4] sm:$0xff] (!%p316_p9)  ;;  %v1551_v15 = vmov (!%p316_p9), 4  }
   0xf   : > { %425 = vperm.xlu1 (!%p316_p9), %1402, %v381_v0   ;;  %386 = vperm.xlu0 (!%p316_p9), %1401, %v381_v0   ;;  %v550_v10 = vld [vmem:[%s2353_s2] sm:$0xff] (!%p316_p9)  ;;  %v635_v11 = vld [vmem:[%s2355_s4 + $0x8] sm:$0xff] (!%p316_p9)  ;;  %v576_v14 = vld [vmem:[%s2354_s3 + $0x10] sm:$0xff] (!%p316_p9)  ;;  %v1552_v16 = vmov (!%p316_p9), 5   ;;  %v1553_v17 = vmov (!%p316_p9), 6   ;;  %v1554_v18 = vmov (!%p316_p9), 7  }
  0x10   : > { %1221 = vmatprep.mubr.bf16.mxu0 (!%p316_p9), %v1548_v2  ;;  %v574_v12 = vld [vmem:[%s2354_s3] sm:$0xff] (!%p316_p9)  ;;  %v575_v13 = vld [vmem:[%s2354_s3 + $0x8] sm:$0xff] (!%p316_p9)  ;;  %v1720_v19 = vld [vmem:[%s2355_s4 + $0x10] sm:$0xff] (!%p316_p9)  ;;  %v1555_v20 = vmov (!%p316_p9), 8   ;;  %p353_p10 = scmp.lt.s32.totalorder (!%p316_p9), %s1641_s17, 1  ;;  %v401_v26 = vshrl.u32 (!%p316_p9), %v360_v23, 7 }
  0x11   : > { %s1556_s12 = smov (!%p316_p9), 17   ;;  %s1557_s18 = smov (!%p316_p9), 16  }
  0x12   : > { %v438_v29 = vsub.s32 (!%p316_p9), 1, %v401_v26  ;;  %v442_v30 = vsub.s32 (!%p316_p9), 5, %v401_v26  ;;  %v402_v31 = vsub.s32 (!%p316_p9), 0, %v401_v26  ;;  %v406_v32 = vsub.s32 (!%p316_p9), 4, %v401_v26  ;;  %s1558_s20 = smov (!%p316_p9), 15   ;;  %s1559_s21 = smov (!%p316_p9), 1  }
  0x13   : > { %429 = vperm.xlu1 (!%p316_p9), %1402, %v382_v3   ;;  %391 = vperm.xlu0 (!%p316_p9), %1401, %v382_v3   ;;  %v480_v40 = vsub.s32 (!%p316_p9), 2, %v401_v26  ;;  %v484_v41 = vsub.s32 (!%p316_p9), 6, %v401_v26  ;;  %v522_v43 = vsub.s32 (!%p316_p9), 3, %v401_v26  ;;  %v526_v44 = vsub.s32 (!%p316_p9), 7, %v401_v26  ;;  %s1560_s25 = smov (!%p316_p9), 127   ;;  %s1561_s26 = smov (!%p316_p9), 113  }
  0x14   : > { %s1344_s30 = sshll.u32 (!%p316_p9), %s1641_s17, 7 }
  0x15   : > { %s354_s27 = scalar_select %p353_p10, %s1641_s17, 1 }
  0x16   : > { %s1564_s17 = smov [#allocation2]  }
  0x17   : > { %1403 = vset.pattern.permute.xlu1 %v1549_v5  ;;  %560 = vperm.xlu0 %1401, %v551_v4   ;;  %s1343_s28 = sshll.u32 %s354_s27, 3  ;;  %s1562_s27 = smov 112  }
  0x18   : > { %471 = vperm.xlu1 %1403, %v382_v3   ;;  %s1740_s11 = scalar_lea.vmem %s2351_s0, %s1343_s28  ;;  %s350_s28 = sand.u32 1, %s1537_s14  }
  0x19   : > { %v359_v33 = vld [vmem:[%s1740_s11] sm:$0xff]  ;;  %s1333_s29 = sshll.u32 %s350_s28, 3 }
  0x1a   : > { %v439_v35 = vrot.slane %v359_v33, %v438_v29  ;;  %v443_v36 = vrot.slane %v359_v33, %v442_v30  ;;  %v403_v37 = vrot.slane %v359_v33, %v402_v31  ;;  %v407_v38 = vrot.slane %v359_v33, %v406_v32 }
  0x1b   : > { %565 = vperm.xlu0 %1401, %v552_v6   ;;  %v481_v50 = vrot.slane %v359_v33, %v480_v40  ;;  %v485_v51 = vrot.slane %v359_v33, %v484_v41  ;;  %v523_v52 = vrot.slane %v359_v33, %v522_v43  ;;  %v527_v53 = vrot.slane %v359_v33, %v526_v44 }
  0x1c   : > { %1404 = vset.pattern.permute.xlu1 %v1548_v2  ;;  %v449_v45 = vrot.slane %v439_v35, %v438_v29  ;;  %v453_v46 = vrot.slane %v443_v36, %v438_v29  ;;  %v413_v47 = vrot.slane %v403_v37, %v402_v31  ;;  %v417_v48 = vrot.slane %v407_v38, %v402_v31 }
  0x1d   : > { %396 = vperm.xlu1 %1404, %v383_v7   ;;  %v491_v60 = vrot.slane %v481_v50, %v480_v40  ;;  %v495_v61 = vrot.slane %v485_v51, %v480_v40  ;;  %v533_v62 = vrot.slane %v523_v52, %v522_v43  ;;  %v537_v63 = vrot.slane %v527_v53, %v522_v43 }
  0x1f   : > { %1407 = vset.pattern.permute.xlu0 %v1547_v1 }
  0x20   : > { %433 = vperm.xlu0 %1407, %v383_v7  }
  0x21   : > { %1405 = vset.pattern.permute.xlu1 %v1550_v8 }
  0x22   : > { %509 = vperm.xlu1 %1405, %v381_v0  }
  0x24   : > { %723 = vperm.xlu0 %1407, %v1691_v9  }
  0x26   : > { %513 = vperm.xlu1 %1405, %v382_v3  }
  0x28   : > { %1408 = vset.pattern.permute.xlu0 %v1549_v5 }
  0x29   : > { %467 = vperm.xlu0 %1408, %v381_v0  }
  0x2a   : > { %517 = vperm.xlu1 %1405, %v383_v7  }
  0x2d   : > { %475 = vperm.xlu0 %1408, %v383_v7  }
  0x2e   : > { %1406 = vset.pattern.permute.xlu1 %v1548_v2 }
  0x2f   : > { %555 = vperm.xlu1 %1406, %v550_v10  }
  0x31   : > { %780 = vperm.xlu0 %1408, %v635_v11  }
  0x33   : > { %579 = vperm.xlu1 %1406, %v574_v12  }
  0x35   : > { %1413 = vset.pattern.permute.xlu0 %v1550_v8 }
  0x36   : > { %829 = vperm.xlu0 %1413, %v1691_v9  }
  0x37   : > { %584 = vperm.xlu1 %1406, %v575_v13  }
  0x3a   : > { %1416 = vset.pattern.permute.xlu0 %v1551_v15 }
  0x3b   : > { %589 = vperm.xlu1 %1406, %v576_v14   ;;  %853 = vperm.xlu0 %1416, %v1691_v9  }
  0x3f   : > { %673 = vperm.xlu1 %1406, %v635_v11   ;;  %1419 = vset.pattern.permute.xlu0 %v1552_v16 }
  0x40   : > { %906 = vperm.xlu0 %1419, %v1691_v9  }
  0x43   : > { %1409 = vset.pattern.permute.xlu1 %v1547_v1 }
  0x44   : > { %727 = vperm.xlu1 %1409, %v635_v11   ;;  %1422 = vset.pattern.permute.xlu0 %v1553_v17 }
  0x45   : > { %959 = vperm.xlu0 %1422, %v1691_v9  }
  0x48   : > { %1410 = vset.pattern.permute.xlu1 %v1549_v5 }
  0x49   : > { %776 = vperm.xlu1 %1410, %v1691_v9   ;;  %1425 = vset.pattern.permute.xlu0 %v1554_v18 }
  0x4a   : > { %1012 = vperm.xlu0 %1425, %v1691_v9  }
  0x4d   : > { %1411 = vset.pattern.permute.xlu1 %v1548_v2 }
  0x4e   : > { %678 = vperm.xlu1 %1411, %v1720_v19   ;;  %1428 = vset.pattern.permute.xlu0 %v1555_v20 }
  0x4f   : > { %1065 = vperm.xlu0 %1428, %v1691_v9  }
  0x52   : > { %1412 = vset.pattern.permute.xlu1 %v1547_v1 }
  0x53   : > { %731 = vperm.xlu1 %1412, %v1720_v19  }
  0x57   : > { %1414 = vset.pattern.permute.xlu1 %v1550_v8 }
  0x58   : > { %833 = vperm.xlu1 %1414, %v635_v11  }
  0x5c   : > { %1415 = vset.pattern.permute.xlu1 %v1549_v5 }
  0x5d   : > { %784 = vperm.xlu1 %1415, %v1720_v19  }
  0x61   : > { %1417 = vset.pattern.permute.xlu1 %v1551_v15 }
  0x62   : > { %857 = vperm.xlu1 %1417, %v635_v11  }
  0x66   : > { %1418 = vset.pattern.permute.xlu1 %v1550_v8 }
  0x67   : > { %837 = vperm.xlu1 %1418, %v1720_v19  }
  0x6b   : > { %1420 = vset.pattern.permute.xlu1 %v1552_v16 }
  0x6c   : > { %910 = vperm.xlu1 %1420, %v635_v11  }
  0x70   : > { %1421 = vset.pattern.permute.xlu1 %v1551_v15 }
  0x71   : > { %861 = vperm.xlu1 %1421, %v1720_v19  }
  0x75   : > { %1423 = vset.pattern.permute.xlu1 %v1553_v17 }
  0x76   : > { %963 = vperm.xlu1 %1423, %v635_v11  }
  0x7a   : > { %1424 = vset.pattern.permute.xlu1 %v1552_v16 }
  0x7b   : > { %914 = vperm.xlu1 %1424, %v1720_v19  }
  0x7f   : > { %1426 = vset.pattern.permute.xlu1 %v1554_v18 }
  0x80   : > { %1016 = vperm.xlu1 %1426, %v635_v11  }
  0x84   : > { %1427 = vset.pattern.permute.xlu1 %v1553_v17 }
  0x85   : > { %967 = vperm.xlu1 %1427, %v1720_v19  }
  0x89   : > { %1429 = vset.pattern.permute.xlu1 %v1555_v20 }
  0x8a   : > { %1069 = vperm.xlu1 %1429, %v635_v11  }
  0x8e   : > { %v426_v21 = vpop.permute.xlu1 %425  ;;  %v387_v22 = vpop.permute.xlu0 %386  ;;  %1430 = vset.pattern.permute.xlu1 %v1554_v18 }
  0x8f   : > { %1020 = vperm.xlu1 %1430, %v1720_v19   ;;  %v454_v55 = vmul.f32 %v449_v45, %v426_v21  ;;  %v455_v56 = vmul.f32 %v453_v46, %v426_v21  ;;  %v418_v57 = vmul.f32 %v413_v47, %v387_v22  ;;  %v419_v58 = vmul.f32 %v417_v48, %v387_v22 }
  0x91   : > { %v460_v0 = vadd.f32 %v454_v55, %v418_v57  ;;  %v461_v1 = vadd.f32 %v455_v56, %v419_v58 }
  0x92   : > { %v430_v24 = vpop.permute.xlu1 %429  ;;  %v392_v25 = vpop.permute.xlu0 %391 }
  0x93   : > { %1432 = vset.pattern.permute.xlu1 %v1548_v2  ;;  %v456_v3 = vmul.f32 %v449_v45, %v430_v24  ;;  %v420_v4 = vmul.f32 %v413_v47, %v392_v25  ;;  %v457_v6 = vmul.f32 %v453_v46, %v430_v24  ;;  %v421_v7 = vmul.f32 %v417_v48, %v392_v25 }
  0x95   : > { %v462_v18 = vadd.f32 %v456_v3, %v420_v4  ;;  %v463_v21 = vadd.f32 %v457_v6, %v421_v7 }
  0x96   : > { %v1742_v27 = vpop.permute.xlu0 %560 }
  0x97   : > { %v472_v28 = vpop.permute.xlu1 %471 }
  0x98   : > { %v498_v12 = vmul.f32 %v491_v60, %v472_v28  ;;  %v499_v13 = vmul.f32 %v495_v61, %v472_v28 }
  0x9a   : > { %v1745_v34 = vpop.permute.xlu0 %565  ;;  %v504_v30 = vadd.f32 %v498_v12, %v462_v18  ;;  %v505_v24 = vadd.f32 %v499_v13, %v463_v21 }
  0x9c   : > { %v1747_v39 = vpop.permute.xlu1 %396 }
  0x9d   : > { %v422_v33 = vmul.f32 %v413_v47, %v1747_v39  ;;  %v423_v50 = vmul.f32 %v417_v48, %v1747_v39 }
  0x9f   : > { %v434_v42 = vpop.permute.xlu0 %433 }
  0xa0   : > { %v458_v25 = vmul.f32 %v449_v45, %v434_v42  ;;  %v459_v40 = vmul.f32 %v453_v46, %v434_v42 }
  0xa1   : > { %v510_v49 = vpop.permute.xlu1 %509 }
  0xa2   : > { %v538_v14 = vmul.f32 %v533_v62, %v510_v49  ;;  %v539_v15 = vmul.f32 %v537_v63, %v510_v49  ;;  %v464_v43 = vadd.f32 %v458_v25, %v422_v33  ;;  %v465_v56 = vadd.f32 %v459_v40, %v423_v50 }
  0xa3   : > { %v1749_v54 = vpop.permute.xlu0 %723 }
  0xa5   : > { %v514_v59 = vpop.permute.xlu1 %513 }
  0xa6   : > { %v540_v20 = vmul.f32 %v533_v62, %v514_v59  ;;  %v541_v22 = vmul.f32 %v537_v63, %v514_v59 }
  0xa8   : > { %v468_v5 = vpop.permute.xlu0 %467  ;;  %v546_v35 = vadd.f32 %v540_v20, %v504_v30  ;;  %v547_v36 = vadd.f32 %v541_v22, %v505_v24 }
  0xa9   : > { %v496_v8 = vmul.f32 %v491_v60, %v468_v5  ;;  %v497_v10 = vmul.f32 %v495_v61, %v468_v5  ;;  %v518_v11 = vpop.permute.xlu1 %517 }
  0xaa   : > { %v570_v52 = vmul.f32 %v1742_v27, %v546_v35  ;;  %v571_v47 = vmul.f32 %v1742_v27, %v547_v36  ;;  %v542_v57 = vmul.f32 %v533_v62, %v518_v11  ;;  %v543_v48 = vmul.f32 %v537_v63, %v518_v11 }
  0xab   : > { %v502_v16 = vadd.f32 %v496_v8, %v460_v0  ;;  %v503_v17 = vadd.f32 %v497_v10, %v461_v1 }
  0xac   : > { %v476_v31 = vpop.permute.xlu0 %475 }
  0xad   : > { %v544_v26 = vadd.f32 %v538_v14, %v502_v16  ;;  %v545_v29 = vadd.f32 %v539_v15, %v503_v17  ;;  %v500_v28 = vmul.f32 %v491_v60, %v476_v31  ;;  %v501_v51 = vmul.f32 %v495_v61, %v476_v31 }
  0xae   : > { %v556_v32 = vpop.permute.xlu1 %555 }
  0xaf   : > { %v568_v37 = vmul.f32 %v556_v32, %v544_v26  ;;  %v569_v38 = vmul.f32 %v556_v32, %v545_v29  ;;  %v506_v53 = vadd.f32 %v500_v28, %v464_v43  ;;  %v507_v0 = vadd.f32 %v501_v51, %v465_v56 }
  0xb1   : > { %v548_v39 = vadd.f32 %v542_v57, %v506_v53  ;;  %v549_v6 = vadd.f32 %v543_v48, %v507_v0  ;;  %v1114_v48 = vld [vmem:[%s2357_s6 + $0x10] sm:$0xff] }
  0xb2   : > { %v580_v41 = vpop.permute.xlu1 %579 }
  0xb3   : > { %v592_v44 = vadd.f32 %v580_v41, %v568_v37  ;;  %v593_v49 = vadd.f32 %v580_v41, %v569_v38  ;;  %v572_v27 = vmul.f32 %v1745_v34, %v548_v39  ;;  %v573_v7 = vmul.f32 %v1745_v34, %v549_v6  ;;  %v1238_v6 = vld [vmem:[%s2360_s9] sm:$0xf] }
  0xb5   : > { %v598_v55 = vsub.f32 0.0, %v592_v44  ;;  %v599_v45 = vsub.f32 0.0, %v593_v49 }
  0xb6   : > { %v585_v58 = vpop.permute.xlu1 %584 }
  0xb7   : > { %v604_v59 = vmul.f32 1.442695, %v598_v55  ;;  %v606_v60 = vmul.f32 1.442695, %v599_v45  ;;  %v594_v42 = vadd.f32 %v585_v58, %v570_v52  ;;  %v595_v46 = vadd.f32 %v585_v58, %v571_v47  ;;  %v1088_v47 = vld [vmem:[%s2356_s5] sm:$0xff]  ;;  %v1844_v58 = vpop.permute.xlu0 %780 }
  0xb9   : > { %1434 = vpow2.f32 %v604_v59  ;;  %v600_v1 = vsub.f32 0.0, %v594_v42  ;;  %v601_v3 = vsub.f32 0.0, %v595_v46 }
  0xba   : > { %1436 = vpow2.f32 %v606_v60  ;;  %v590_v5 = vpop.permute.xlu1 %589 }
  0xbb   : > { %v608_v61 = vmul.f32 1.442695, %v600_v1  ;;  %v610_v4 = vmul.f32 1.442695, %v601_v3  ;;  %v596_v62 = vadd.f32 %v590_v5, %v572_v27  ;;  %v597_v10 = vadd.f32 %v590_v5, %v573_v7  ;;  %v1848_v59 = vpop.permute.xlu0 %829  ;;  %v1112_v1 = vld [vmem:[%s2357_s6] sm:$0xff] }
  0xbd   : > { %1438 = vpow2.f32 %v608_v61  ;;  %v602_v12 = vsub.f32 0.0, %v596_v62  ;;  %v603_v63 = vsub.f32 0.0, %v597_v10  ;;  %v1090_v61 = vld [vmem:[%s2356_s5 + $0x10] sm:$0xff] }
  0xbe   : > { %1440 = vpow2.f32 %v610_v4  ;;  %v1778_v28 = vpop.permute.xlu1 %673 }
  0xbf   : > { %v612_v11 = vmul.f32 1.442695, %v602_v12  ;;  %v614_v21 = vmul.f32 1.442695, %v603_v63 }
  0xc3   : > { %v1435_v8 = vpop.eup %1434  ;;  %v1784_v40 = vpop.permute.xlu1 %727 }
  0xc4   : > { %v1437_v13 = vpop.eup %1436  ;;  %v616_v14 = vadd.f32 1.0, %v1435_v8  ;;  %v1230_v8 = vld [vmem:[%s2359_s8] sm:$0xf] }
  0xc5   : > { %v617_v15 = vadd.f32 1.0, %v1437_v13 }
  0xc6   : > { %1442 = vrcp.f32 %v616_v14 }
  0xc7   : > { %v1439_v16 = vpop.eup %1438  ;;  %1444 = vrcp.f32 %v617_v15 }
  0xc8   : > { %v1441_v17 = vpop.eup %1440  ;;  %v618_v18 = vadd.f32 1.0, %v1439_v16 }
  0xc9   : > { %v619_v20 = vadd.f32 1.0, %v1441_v17 }
  0xca   : > { %1446 = vrcp.f32 %v618_v18 }
  0xcb   : > { %1448 = vpow2.f32 %v612_v11 }
  0xcc   : > { %1450 = vrcp.f32 %v619_v20 }
  0xcd   : > { %1452 = vpow2.f32 %v614_v21 }
  0xd0   : > { %v1443_v34 = vpop.eup %1442 }
  0xd1   : > { %v1757_v22 = vmul.f32 %v1443_v34, %v592_v44  ;;  %v1445_v26 = vpop.eup %1444  ;;  %v1791_v44 = vpop.permute.xlu1 %776 }
  0xd2   : > { %v1761_v31 = vmul.f32 %v1445_v26, %v593_v49 }
  0xd3   : > { %637 = vrot.lane.b32.xlu1 %v1757_v22, %s1556_s12 }
  0xd4   : > { %v1447_v29 = vpop.eup %1446 }
  0xd5   : > { %v1449_v30 = vpop.eup %1448  ;;  %v1763_v32 = vmul.f32 %v1447_v29, %v594_v42  ;;  %v1798_v49 = vpop.permute.xlu1 %678  ;;  %v1089_v42 = vld [vmem:[%s2356_s5 + $0x8] sm:$0xff] }
  0xd6   : > { %v1451_v24 = vpop.eup %1450  ;;  %v620_v25 = vadd.f32 1.0, %v1449_v30 }
  0xd7   : > { %639 = vrot.lane.b32.xlu0 %v1763_v32, %s1556_s12  ;;  %643 = vrot.lane.b32.xlu1 %v1761_v31, %s1556_s12  ;;  %v1453_v33 = vpop.eup %1452  ;;  %v1769_v35 = vmul.f32 %v1451_v24, %v595_v46 }
  0xd8   : > { %v621_v36 = vadd.f32 1.0, %v1453_v33  ;;  %1454 = vrcp.f32 %v620_v25 }
  0xd9   : > { %v1802_v50 = vpop.permute.xlu1 %731 }
  0xda   : > { %1456 = vrcp.f32 %v621_v36 }
  0xdb   : > { %645 = vrot.lane.b32.xlu0 %v1769_v35, %s1556_s12  ;;  %693 = vrot.lane.b32.xlu1 %v1757_v22, %s1557_s18 }
  0xdd   : > { %v1808_v51 = vpop.permute.xlu1 %833 }
  0xdf   : > { %695 = vrot.lane.b32.xlu0 %v1763_v32, %s1557_s18  ;;  %699 = vrot.lane.b32.xlu1 %v1761_v31, %s1557_s18 }
  0xe1   : > { %v1812_v52 = vpop.permute.xlu1 %784 }
  0xe2   : > { %v1455_v37 = vpop.eup %1454 }
  0xe3   : > { %701 = vrot.lane.b32.xlu0 %v1769_v35, %s1557_s18  ;;  %746 = vrot.lane.b32.xlu1 %v1757_v22, %s1558_s20  ;;  %v1782_v38 = vmul.f32 %v1455_v37, %v596_v62  ;;  %v1902_v62 = vand.u32 127, %v360_v23 }
  0xe4   : > { %v1457_v41 = vpop.eup %1456 }
  0xe5   : > { %v1789_v43 = vmul.f32 %v1457_v41, %v597_v10  ;;  %v1818_v53 = vpop.permute.xlu1 %857  ;;  %vm649_vm0 = vcmp.lt.s32.totalorder %v1902_v62, 17  ;;  %v1917_v23 = vadd.s32 128, %v1902_v62  ;;  %v363_v15 = vand.u32 15, %v1902_v62 }
  0xe6   : > { %vm705_vm1 = vcmp.lt.s32.totalorder %v1902_v62, 16  ;;  %vm365_vm2 = vcmp.ge.s32.totalorder %v1902_v62, 16  ;;  %vm758_vm7 = vcmp.lt.s32.totalorder %v1902_v62, 15  ;;  %vm811_vm10 = vcmp.lt.s32.totalorder %v1902_v62, 1 }
  0xe7   : > { %748 = vrot.lane.b32.xlu0 %v1763_v32, %s1558_s20  ;;  %752 = vrot.lane.b32.xlu1 %v1761_v31, %s1558_s20  ;;  %v364_v18 = vand.u32 15, %v1917_v23  ;;  %vm1927_vm3 = vcmp.ge.s32.totalorder %v363_v15, 1  ;;  %vm1969_vm6 = vcmp.lt.s32.totalorder %v363_v15, 15  ;;  %vm888_vm11 = vcmp.lt.s32.totalorder %v1902_v62, 127 }
  0xe8   : > { %vm1947_vm5 = vmand %vm365_vm2, %vm1927_vm3  ;;  %vm376_vm12 = vcmp.lt.s32.totalorder %v1917_v23, 240  ;;  %vm941_vm13 = vcmp.lt.s32.totalorder %v1902_v62, 113  ;;  %vm994_vm14 = vcmp.lt.s32.totalorder %v1902_v62, 112  ;;  %vm1047_vm15 = vcmp.lt.s32.totalorder %v1902_v62, 111 }
  0xe9   : > { %v1822_v55 = vpop.permute.xlu1 %837  ;;  %vm1939_vm4 = vcmp.ge.s32.totalorder %v364_v18, 1  ;;  %vm1974_vm8 = vcmp.lt.s32.totalorder %v364_v18, 15  ;;  %vm1982_vm9 = vmand %vm365_vm2, %vm1969_vm6 }
  0xeb   : > { %754 = vrot.lane.b32.xlu0 %v1769_v35, %s1558_s20  ;;  %641 = vrot.lane.b32.xlu1 %v1782_v38, %s1556_s12 }
  0xed   : > { %v1826_v45 = vpop.permute.xlu1 %910 }
  0xef   : > { %647 = vrot.lane.b32.xlu0 %v1789_v43, %s1556_s12  ;;  %697 = vrot.lane.b32.xlu1 %v1782_v38, %s1557_s18  ;;  %s352_s12 = scalar_lea.vmem [#allocation2], %s1333_s29 }
  0xf1   : > { %v1838_v56 = vpop.permute.xlu1 %861 }
  0xf3   : > { %703 = vrot.lane.b32.xlu0 %v1789_v43, %s1557_s18  ;;  %799 = vrot.lane.b32.xlu1 %v1757_v22, %s1559_s21  ;;  %s1563_s18 = smov 111  }
  0xf5   : > { %v1842_v57 = vpop.permute.xlu1 %963 }
  0xf7   : > { %801 = vrot.lane.b32.xlu0 %v1763_v32, %s1559_s21  ;;  %805 = vrot.lane.b32.xlu1 %v1761_v31, %s1559_s21 }
  0xfa   : > { %v1852_v60 = vpop.permute.xlu1 %914 }
  0xfb   : > { %807 = vrot.lane.b32.xlu0 %v1769_v35, %s1559_s21  ;;  %750 = vrot.lane.b32.xlu1 %v1782_v38, %s1558_s20 }
  0xff   : > { %756 = vrot.lane.b32.xlu0 %v1789_v43, %s1558_s20  ;;  %803 = vrot.lane.b32.xlu1 %v1782_v38, %s1559_s21  ;;  %v1861_v46 = vpop.permute.xlu1 %1016  ;;  %s1270_s20 = sshll.u32 %s352_s12, 4  ;;  %s2311_s20 = int_to_ptr.vmem [resolvable:$true] %s1270_s20 }
 0x103   : > { %809 = vrot.lane.b32.xlu0 %v1789_v43, %s1559_s21  ;;  %876 = vrot.lane.b32.xlu1 %v1757_v22, %s1560_s25 }
 0x104   : > { %v1870_v0 = vpop.permute.xlu1 %967 }
 0x107   : > { %878 = vrot.lane.b32.xlu0 %v1763_v32, %s1560_s25  ;;  %882 = vrot.lane.b32.xlu1 %v1761_v31, %s1560_s25 }
 0x109   : > { %v1880_v39 = vpop.permute.xlu1 %1069 }
 0x10b   : > { %884 = vrot.lane.b32.xlu0 %v1769_v35, %s1560_s25  ;;  %929 = vrot.lane.b32.xlu1 %v1757_v22, %s1561_s26 }
 0x10e   : > { %v1893_v5 = vpop.permute.xlu1 %1020 }
 0x10f   : > { %931 = vrot.lane.b32.xlu0 %v1763_v32, %s1561_s26  ;;  %935 = vrot.lane.b32.xlu1 %v1761_v31, %s1561_s26 }
 0x113   : > { %937 = vrot.lane.b32.xlu0 %v1769_v35, %s1561_s26  ;;  %886 = vrot.lane.b32.xlu1 %v1789_v43, %s1560_s25 }
 0x117   : > { %880 = vrot.lane.b32.xlu0 %v1782_v38, %s1560_s25  ;;  %984 = vrot.lane.b32.xlu1 %v1763_v32, %s1562_s27  ;;  %s2309_s25 = scalar_lea.hbm %s2361_s10, %s1344_s30 }
 0x11b   : > { %982 = vrot.lane.b32.xlu0 %v1757_v22, %s1562_s27  ;;  %990 = vrot.lane.b32.xlu1 %v1769_v35, %s1562_s27 }
 0x11f   : > { %988 = vrot.lane.b32.xlu0 %v1761_v31, %s1562_s27  ;;  %1093 = vperm.xlu1 %1432, %v1088_v47  }
 0x123   : > { %1073 = vperm.xlu0 %1428, %v1720_v19   ;;  %933 = vrot.lane.b32.xlu1 %v1782_v38, %s1561_s26  ;;  %v1859_v19 = vpop.permute.xlu0 %853 }
 0x127   : > { %1431 = vset.pattern.permute.xlu0 %v1548_v2  ;;  %939 = vrot.lane.b32.xlu1 %v1789_v43, %s1561_s26  ;;  %v1113_v2 = vld [vmem:[%s2357_s6 + $0x8] sm:$0xff]  ;;  %s1487_s26 = sshll.u32 %s1564_s17, 4  ;;  %s1488_s26 = int_to_ptr.vmem [resolvable:$false] %s1487_s26 }
 0x128   : > { %668 = vperm.xlu0 %1431, %v1691_v9   ;;  %v1868_v9 = vpop.permute.xlu0 %906  ;;  %s1489_s29 = scalar_lea.vmem %s1488_s26, 256  ;;  %p1490_p0 = scmp.lt.s32.totalorder %s2311_s20, %s1488_s26 }
 0x12b   : > { %1037 = vrot.lane.b32.xlu1 %v1763_v32, %s1563_s18 }
 0x12c   : > { %1098 = vperm.xlu0 %1431, %v1089_v42   ;;  %v1878_v3 = vpop.permute.xlu0 %959 }
 0x12f   : > { %1043 = vrot.lane.b32.xlu1 %v1769_v35, %s1563_s18 }
 0x130   : > { %1035 = vrot.lane.b32.xlu0 %v1757_v22, %s1563_s18  ;;  %v1891_v4 = vpop.permute.xlu0 %1012 }
 0x133   : > { %1122 = vperm.xlu1 %1432, %v1113_v2  }
 0x134   : > { %1041 = vrot.lane.b32.xlu0 %v1761_v31, %s1563_s18  ;;  %v1898_v27 = vpop.permute.xlu0 %1065 }
 0x137   : > { %992 = vrot.lane.b32.xlu1 %v1789_v43, %s1562_s27 }
 0x138   : > { %1117 = vperm.xlu0 %1431, %v1112_v1  }
 0x13b   : > { %1039 = vrot.lane.b32.xlu1 %v1782_v38, %s1563_s18 }
 0x13c   : > { %986 = vrot.lane.b32.xlu0 %v1782_v38, %s1562_s27 }
 0x13f   : > { %1127 = vperm.xlu1 %1432, %v1114_v48  }
 0x140   : > { %1103 = vperm.xlu0 %1431, %v1090_v61  }
 0x143   : > { %1241 = vperm.xlu1 %1432, %v1238_v6  }
 0x144   : > { %1045 = vrot.lane.b32.xlu0 %v1789_v43, %s1563_s18  ;;  %s1483_s18 = scalar_lea.vmem %s2311_s20, 128 }
 0x145   : > { %v638_v7 = vpop.permute.xlu1 %637  ;;  %p1484_p11 = scmp.ne.s32.totalorder %s2311_s20, %s1483_s18  ;;  %p1491_p1 = scmp.lt.s32.totalorder %s1489_s29, %s1483_s18 }
 0x147   : > { %p1485_p12 = pnand %p1484_p11, %p1658_p5  ;;  %p1492_p2 = por %p1491_p1, %p1490_p0 }
 0x148   : > { %1233 = vperm.xlu0 %1431, %v1230_v8  }
 0x149   : > { %v640_v10 = vpop.permute.xlu0 %639  ;;  %v644_v12 = vpop.permute.xlu1 %643  ;;  %p1486_p13 = pneg %p1485_p12 }
 0x14a   : > { %v1910_v13 = vsel %vm649_vm0, %v638_v7, %v644_v12  ;;  %v1914_v14 = vsel %vm649_vm0, %v644_v12, %v638_v7 }
 0x14b   : > { %p1493_p3 = pnand %p1492_p2, %p1486_p13 }
 0x14d   : > { %v646_v16 = vpop.permute.xlu0 %645  ;;  %v694_v63 = vpop.permute.xlu1 %693 }
 0x14e   : > { %v651_v11 = vsel %vm649_vm0, %v640_v10, %v646_v16  ;;  %v654_v17 = vsel %vm649_vm0, %v646_v16, %v640_v10 }
 0x14f   : > { %v663_v25 = vsel %vm1939_vm4, %v651_v11, 0.0  ;;  %v662_v33 = vsel %vm1947_vm5, %v654_v17, 0.0 }
 0x150   : > { %v684_v42 = vmul.f32 %v1778_v28, %v663_v25  ;;  %v683_v48 = vmul.f32 %v1778_v28, %v662_v33 }
 0x151   : > { %v696_v21 = vpop.permute.xlu0 %695  ;;  %v700_v34 = vpop.permute.xlu1 %699 }
 0x152   : > { %v1933_v26 = vsel %vm705_vm1, %v694_v63, %v700_v34  ;;  %v1937_v29 = vsel %vm705_vm1, %v700_v34, %v694_v63 }
 0x155   : > { %v702_v36 = vpop.permute.xlu0 %701  ;;  %v1955_v37 = vpop.permute.xlu1 %746 }
 0x156   : > { %v707_v41 = vsel %vm705_vm1, %v696_v21, %v702_v36  ;;  %v710_v47 = vsel %vm705_vm1, %v702_v36, %v696_v21 }
 0x157   : > { %v718_v2 = vsel %vm365_vm2, %v710_v47, 0.0  ;;  %v737_v1 = vmul.f32 %v1784_v40, %v707_v41 }
 0x158   : > { %v736_v61 = vmul.f32 %v1784_v40, %v718_v2 }
 0x159   : > { %v743_v6 = vadd.f32 %v737_v1, %v684_v42  ;;  %v749_v7 = vpop.permute.xlu0 %748  ;;  %v1967_v8 = vpop.permute.xlu1 %752 }
 0x15a   : > { %v742_v10 = vadd.f32 %v736_v61, %v683_v48 }
 0x15d   : > { %v755_v16 = vpop.permute.xlu0 %754  ;;  %v642_v63 = vpop.permute.xlu1 %641 }
 0x15e   : > { %v760_v40 = vsel %vm758_vm7, %v749_v7, %v755_v16  ;;  %v763_v15 = vsel %vm758_vm7, %v755_v16, %v749_v7 }
 0x15f   : > { %v771_v17 = vsel %vm1982_vm9, %v763_v15, 0.0  ;;  %v772_v18 = vsel %vm1974_vm8, %v760_v40, 0.0 }
 0x160   : > { %v789_v21 = vmul.f32 %v1844_v58, %v771_v17  ;;  %v790_v34 = vmul.f32 %v1844_v58, %v772_v18 }
 0x161   : > { %v648_v25 = vpop.permute.xlu0 %647  ;;  %v698_v33 = vpop.permute.xlu1 %697 }
 0x162   : > { %v795_v36 = vadd.f32 %v789_v21, %v742_v10  ;;  %v796_v41 = vadd.f32 %v790_v34, %v743_v6  ;;  %v652_v47 = vsel %vm649_vm0, %v642_v63, %v648_v25  ;;  %v655_v42 = vsel %vm649_vm0, %v648_v25, %v642_v63  ;;  %vm2148_vm0 = vmand %vm376_vm12, %vm1939_vm4 }
 0x163   : > { %v665_v2 = vsel %vm1939_vm4, %v652_v47, 0.0  ;;  %v664_v1 = vsel %vm1947_vm5, %v655_v42, 0.0 }
 0x164   : > { %v686_v7 = vmul.f32 %v1798_v49, %v665_v2  ;;  %v685_v63 = vmul.f32 %v1798_v49, %v664_v1  ;;  %v866_v1 = vmul.f32 %v1818_v53, %v1763_v32 }
 0x165   : > { %v704_v48 = vpop.permute.xlu0 %703  ;;  %v2004_v61 = vpop.permute.xlu1 %799 }
 0x166   : > { %v708_v58 = vsel %vm705_vm1, %v698_v33, %v704_v48  ;;  %v711_v6 = vsel %vm705_vm1, %v704_v48, %v698_v33  ;;  %v867_v48 = vmul.f32 %v1818_v53, %v1769_v35  ;;  %vm2199_vm1 = vmand %vm376_vm12, %vm1974_vm8 }
 0x167   : > { %v720_v10 = vsel %vm365_vm2, %v711_v6, 0.0  ;;  %v739_v16 = vmul.f32 %v1802_v50, %v708_v58 }
 0x168   : > { %v738_v40 = vmul.f32 %v1802_v50, %v720_v10 }
 0x169   : > { %v745_v15 = vadd.f32 %v739_v16, %v686_v7  ;;  %v802_v17 = vpop.permute.xlu0 %801  ;;  %v2016_v18 = vpop.permute.xlu1 %805 }
 0x16a   : > { %v744_v21 = vadd.f32 %v738_v40, %v685_v63  ;;  %v812_v24 = vsel %vm811_vm10, %v2004_v61, %v2016_v18 }
 0x16d   : > { %v808_v34 = vpop.permute.xlu0 %807  ;;  %v751_v25 = vpop.permute.xlu1 %750 }
 0x16e   : > { %v813_v33 = vsel %vm811_vm10, %v802_v17, %v808_v34  ;;  %v816_v47 = vsel %vm811_vm10, %v808_v34, %v802_v17 }
 0x16f   : > { %v824_v49 = vsel %vm1927_vm3, %v816_v47, 0.0  ;;  %v825_v50 = vsel %vm1939_vm4, %v813_v33, 0.0 }
 0x170   : > { %v842_v42 = vmul.f32 %v1808_v51, %v824_v49  ;;  %v843_v2 = vmul.f32 %v1808_v51, %v825_v50 }
 0x171   : > { %v757_v58 = vpop.permute.xlu0 %756  ;;  %v804_v6 = vpop.permute.xlu1 %803 }
 0x172   : > { %v848_v7 = vadd.f32 %v842_v42, %v795_v36  ;;  %v849_v10 = vadd.f32 %v843_v2, %v796_v41  ;;  %v761_v16 = vsel %vm758_vm7, %v751_v25, %v757_v58  ;;  %v764_v63 = vsel %vm758_vm7, %v757_v58, %v751_v25 }
 0x173   : > { %v773_v40 = vsel %vm1982_vm9, %v764_v63, 0.0  ;;  %v774_v51 = vsel %vm1974_vm8, %v761_v16, 0.0  ;;  %v868_v2 = vmul.f32 %v1838_v56, %v1782_v38 }
 0x174   : > { %v791_v32 = vmul.f32 %v1812_v52, %v773_v40  ;;  %v792_v35 = vmul.f32 %v1812_v52, %v774_v51  ;;  %v2043_v53 = vadd.f32 %v867_v48, %v849_v10  ;;  %v2045_v36 = vadd.f32 %v866_v1, %v848_v7 }
 0x175   : > { %v810_v41 = vpop.permute.xlu0 %809  ;;  %v877_v25 = vpop.permute.xlu1 %876  ;;  %v869_v1 = vmul.f32 %v1838_v56, %v1789_v43 }
 0x176   : > { %v814_v17 = vsel %vm811_vm10, %v804_v6, %v810_v41  ;;  %v817_v34 = vsel %vm811_vm10, %v810_v41, %v804_v6  ;;  %v797_v49 = vadd.f32 %v791_v32, %v744_v21  ;;  %v798_v52 = vadd.f32 %v792_v35, %v745_v15 }
 0x177   : > { %v826_v33 = vsel %vm1927_vm3, %v817_v34, 0.0  ;;  %v827_v47 = vsel %vm1939_vm4, %v814_v17, 0.0  ;;  %v2077_v17 = vmul.f32 %v1859_v19, %v1757_v22  ;;  %v2081_v34 = vmul.f32 %v1859_v19, %v1761_v31 }
 0x178   : > { %v844_v50 = vmul.f32 %v1822_v55, %v826_v33  ;;  %v845_v42 = vmul.f32 %v1822_v55, %v827_v47  ;;  %v759_v33 = vsel %vm758_vm7, %v1955_v37, %v1967_v8  ;;  %v762_v47 = vsel %vm758_vm7, %v1967_v8, %v1955_v37 }
 0x179   : > { %v879_v6 = vpop.permute.xlu0 %878  ;;  %v883_v7 = vpop.permute.xlu1 %882  ;;  %v716_v22 = vsel %vm365_vm2, %v1937_v29, 0.0  ;;  %v815_v31 = vsel %vm811_vm10, %v2016_v18, %v2004_v61  ;;  %v660_v37 = vsel %vm1947_vm5, %v1914_v14, 0.0  ;;  %v769_v8 = vsel %vm1982_vm9, %v762_v47, 0.0 }
 0x17a   : > { %v850_v48 = vadd.f32 %v844_v50, %v797_v49  ;;  %v851_v58 = vadd.f32 %v845_v42, %v798_v52  ;;  %v770_v49 = vsel %vm1974_vm8, %v759_v33, 0.0  ;;  %v661_v42 = vsel %vm1939_vm4, %v1910_v13, 0.0 }
 0x17b   : > { %v735_v14 = vmul.f32 %v1749_v54, %v1933_v26  ;;  %v889_v13 = vsel %vm888_vm11, %v877_v25, %v883_v7  ;;  %v787_v61 = vmul.f32 %v1791_v44, %v769_v8  ;;  %v788_v18 = vmul.f32 %v1791_v44, %v770_v49 }
 0x17c   : > { %v2061_v10 = vadd.f32 %v868_v2, %v850_v48  ;;  %v2063_v16 = vadd.f32 %v869_v1, %v851_v58  ;;  %v734_v1 = vmul.f32 %v1749_v54, %v716_v22  ;;  %v822_v48 = vsel %vm1927_vm3, %v815_v31, 0.0 }
 0x17d   : > { %v885_v21 = vpop.permute.xlu0 %884  ;;  %v930_v15 = vpop.permute.xlu1 %929  ;;  %v892_v58 = vsel %vm888_vm11, %v883_v7, %v877_v25  ;;  %v899_v33 = vsel %vm1969_vm6, %v889_v13, 0.0  ;;  %vm1182_vm2 = vcmask 1043456  }
 0x17e   : > { %v890_v19 = vsel %vm888_vm11, %v879_v6, %v885_v21  ;;  %v893_v29 = vsel %vm888_vm11, %v885_v21, %v879_v6  ;;  %v823_v21 = vsel %vm1939_vm4, %v812_v24, 0.0  ;;  %v900_v31 = vsel %vm1974_vm8, %v892_v58, 0.0 }
 0x17f   : > { %v901_v26 = vsel %vm1969_vm6, %v890_v19, 0.0  ;;  %v902_v54 = vsel %vm1974_vm8, %v893_v29, 0.0 }
 0x180   : > { %v919_v47 = vmul.f32 %v1826_v45, %v901_v26  ;;  %v920_v19 = vmul.f32 %v1826_v45, %v902_v54 }
 0x181   : > { %v932_v63 = vpop.permute.xlu0 %931  ;;  %v936_v40 = vpop.permute.xlu1 %935 }
 0x182   : > { %v942_v44 = vsel %vm941_vm13, %v930_v15, %v936_v40  ;;  %v945_v29 = vsel %vm941_vm13, %v936_v40, %v930_v15  ;;  %v917_v15 = vmul.f32 %v1868_v9, %v899_v33  ;;  %v918_v40 = vmul.f32 %v1868_v9, %v900_v31 }
 0x183   : > { %v952_v24 = vsel %vm1927_vm3, %v942_v44, 0.0  ;;  %v925_v58 = vadd.f32 %v919_v47, %v2045_v36 }
 0x185   : > { %v938_v51 = vpop.permute.xlu0 %937  ;;  %v2065_v55 = vpop.permute.xlu1 %886 }
 0x186   : > { %v943_v28 = vsel %vm941_vm13, %v932_v63, %v938_v51  ;;  %v946_v2 = vsel %vm941_vm13, %v938_v51, %v932_v63  ;;  %v840_v51 = vmul.f32 %v1848_v59, %v822_v48 }
 0x187   : > { %v954_v25 = vsel %vm1927_vm3, %v943_v28, 0.0  ;;  %v955_v7 = vsel %vm2148_vm0, %v946_v2, 0.0 }
 0x188   : > { %v972_v28 = vmul.f32 %v1842_v57, %v954_v25  ;;  %v973_v2 = vmul.f32 %v1842_v57, %v955_v7  ;;  %v926_v57 = vadd.f32 %v920_v19, %v2043_v53 }
 0x189   : > { %v2067_v32 = vpop.permute.xlu0 %880  ;;  %v985_v38 = vpop.permute.xlu1 %984 }
 0x18a   : > { %v978_v36 = vadd.f32 %v972_v28, %v925_v58 }
 0x18d   : > { %v2069_v35 = vpop.permute.xlu0 %982  ;;  %v991_v43 = vpop.permute.xlu1 %990 }
 0x18e   : > { %v999_v30 = vsel %vm994_vm14, %v991_v43, %v985_v38  ;;  %v996_v48 = vsel %vm994_vm14, %v985_v38, %v991_v43 }
 0x18f   : > { %v1008_v13 = vsel %vm376_vm12, %v999_v30, 0.0 }
 0x190   : > { %v1026_v9 = vmul.f32 %v1861_v46, %v1008_v13 }
 0x191   : > { %v2071_v56 = vpop.permute.xlu0 %988 }
 0x192   : > { %v998_v38 = vsel %vm994_vm14, %v2071_v56, %v2069_v35  ;;  %v995_v7 = vsel %vm994_vm14, %v2069_v35, %v2071_v56 }
 0x193   : > { %v1023_v28 = vmul.f32 %v1891_v4, %v995_v7 }
 0x19e   : > { %v2073_v41 = vpop.permute.xlu1 %1093 }
 0x1a2   : > { %v2113_v52 = vpop.permute.xlu0 %1073  ;;  %v2115_v50 = vpop.permute.xlu1 %933 }
 0x1a6   : > { %v2160_v63 = vpop.permute.xlu1 %939 }
 0x1a7   : > { %v669_v22 = vpop.permute.xlu0 %668 }
 0x1a8   : > { %v681_v8 = vmul.f32 %v669_v22, %v660_v37  ;;  %v682_v49 = vmul.f32 %v669_v22, %v661_v42  ;;  %v841_v42 = vmul.f32 %v1848_v59, %v823_v21  ;;  %v970_v59 = vmul.f32 %v1878_v3, %v952_v24 }
 0x1a9   : > { %v1025_v21 = vmul.f32 %v1861_v46, %v996_v48  ;;  %v1006_v46 = vsel %vm376_vm12, %v998_v38, 0.0 }
 0x1aa   : > { %v740_v26 = vadd.f32 %v734_v1, %v681_v8  ;;  %v741_v45 = vadd.f32 %v735_v14, %v682_v49  ;;  %v1038_v37 = vpop.permute.xlu1 %1037  ;;  %v953_v14 = vsel %vm2148_vm0, %v945_v29, 0.0 }
 0x1ab   : > { %v1099_v54 = vpop.permute.xlu0 %1098  ;;  %v1031_v56 = vadd.f32 %v1025_v21, %v978_v36  ;;  %v971_v29 = vmul.f32 %v1878_v3, %v953_v14 }
 0x1ac   : > { %v793_v43 = vadd.f32 %v787_v61, %v740_v26  ;;  %v794_v1 = vadd.f32 %v788_v18, %v741_v45  ;;  %v979_v61 = vadd.f32 %v973_v2, %v926_v57  ;;  %v1024_v2 = vmul.f32 %v1891_v4, %v1006_v46 }
 0x1ae   : > { %v846_v18 = vadd.f32 %v840_v51, %v793_v43  ;;  %v847_v44 = vadd.f32 %v841_v42, %v794_v1  ;;  %v1044_v25 = vpop.permute.xlu1 %1043  ;;  %v1032_v19 = vadd.f32 %v1026_v9, %v979_v61 }
 0x1af   : > { %v1049_v33 = vsel %vm1047_vm15, %v1038_v37, %v1044_v25  ;;  %v1052_v47 = vsel %vm1047_vm15, %v1044_v25, %v1038_v37  ;;  %v1036_v30 = vpop.permute.xlu0 %1035  ;;  %v947_v25 = vsel %vm941_vm13, %v2160_v63, %v2115_v50 }
 0x1b0   : > { %v870_v22 = vadd.f32 %v2077_v17, %v846_v18  ;;  %v871_v51 = vadd.f32 %v2081_v34, %v847_v44  ;;  %v1060_v31 = vsel %vm1969_vm6, %v1049_v33, 0.0  ;;  %v1061_v35 = vsel %vm2199_vm1, %v1052_v47, 0.0 }
 0x1b1   : > { %v1078_v8 = vmul.f32 %v1880_v39, %v1060_v31  ;;  %v1079_v49 = vmul.f32 %v1880_v39, %v1061_v35  ;;  %v891_v17 = vsel %vm888_vm11, %v2067_v32, %v2065_v55  ;;  %v944_v44 = vsel %vm941_vm13, %v2115_v50, %v2160_v63 }
 0x1b2   : > { %v923_v34 = vadd.f32 %v917_v15, %v870_v22  ;;  %v924_v24 = vadd.f32 %v918_v40, %v871_v51  ;;  %v1123_v57 = vpop.permute.xlu1 %1122  ;;  %v903_v61 = vsel %vm1969_vm6, %v891_v17, 0.0  ;;  %v956_v63 = vsel %vm1927_vm3, %v944_v44, 0.0 }
 0x1b3   : > { %v1084_v48 = vadd.f32 %v1078_v8, %v1031_v56  ;;  %v1085_v13 = vadd.f32 %v1079_v49, %v1032_v19  ;;  %v1042_v26 = vpop.permute.xlu0 %1041  ;;  %v921_v50 = vmul.f32 %v1852_v60, %v903_v61  ;;  %v957_v11 = vsel %vm2148_vm0, %v947_v25, 0.0 }
 0x1b4   : > { %v1048_v45 = vsel %vm1047_vm15, %v1036_v30, %v1042_v26  ;;  %v1051_v3 = vsel %vm1047_vm15, %v1042_v26, %v1036_v30  ;;  %v976_v39 = vadd.f32 %v970_v59, %v923_v34  ;;  %v977_v37 = vadd.f32 %v971_v29, %v924_v24 }
 0x1b5   : > { %v1108_v42 = vmul.f32 %v1099_v54, %v1084_v48  ;;  %v1109_v58 = vmul.f32 %v1099_v54, %v1085_v13  ;;  %v1058_v15 = vsel %vm1969_vm6, %v1048_v45, 0.0  ;;  %v1059_v4 = vsel %vm2199_vm1, %v1051_v3, 0.0 }
 0x1b6   : > { %v1076_v40 = vmul.f32 %v1898_v27, %v1058_v15  ;;  %v1077_v38 = vmul.f32 %v1898_v27, %v1059_v4  ;;  %v1029_v43 = vadd.f32 %v1023_v28, %v976_v39  ;;  %v1030_v1 = vadd.f32 %v1024_v2, %v977_v37  ;;  %v993_v47 = vpop.permute.xlu1 %992 }
 0x1b7   : > { %v2238_v14 = vadd.f32 %v1123_v57, %v1108_v42  ;;  %v2240_v21 = vadd.f32 %v1123_v57, %v1109_v58  ;;  %v1118_v59 = vpop.permute.xlu0 %1117  ;;  %v894_v54 = vsel %vm888_vm11, %v2065_v55, %v2067_v32  ;;  %v974_v20 = vmul.f32 %v1870_v0, %v956_v63 }
 0x1b8   : > { %v1082_v9 = vadd.f32 %v1076_v40, %v1029_v43  ;;  %v1083_v36 = vadd.f32 %v1077_v38, %v1030_v1  ;;  %v904_v7 = vsel %vm1974_vm8, %v894_v54, 0.0  ;;  %v975_v6 = vmul.f32 %v1870_v0, %v957_v11 }
 0x1b9   : > { %v1138_v18 = vsub.f32 0.0, %v2238_v14  ;;  %v1139_v27 = vsub.f32 0.0, %v2240_v21  ;;  %vm1178_vm3 = vcmask 195584  }
 0x1ba   : > { %v1106_v55 = vmul.f32 %v2073_v41, %v1082_v9  ;;  %v1107_v32 = vmul.f32 %v2073_v41, %v1083_v36  ;;  %v922_v41 = vmul.f32 %v1852_v60, %v904_v7  ;;  %v927_v60 = vadd.f32 %v921_v50, %v2061_v10  ;;  %v1040_v2 = vpop.permute.xlu1 %1039 }
 0x1bb   : > { %v1146_v46 = vmul.f32 1.442695, %v1138_v18  ;;  %v1148_v33 = vmul.f32 1.442695, %v1139_v27  ;;  %v987_v30 = vpop.permute.xlu0 %986 }
 0x1bc   : > { %v2262_v22 = vadd.f32 %v1118_v59, %v1106_v55  ;;  %v2264_v51 = vadd.f32 %v1118_v59, %v1107_v32  ;;  %v1000_v31 = vsel %vm994_vm14, %v993_v47, %v987_v30  ;;  %v997_v19 = vsel %vm994_vm14, %v987_v30, %v993_v47 }
 0x1bd   : > { %1458 = vpow2.f32 %v1146_v46  ;;  %v1010_v8 = vsel %vm376_vm12, %v1000_v31, 0.0  ;;  %v928_v34 = vadd.f32 %v922_v41, %v2063_v16  ;;  %v1027_v24 = vmul.f32 %v1893_v5, %v997_v19 }
 0x1be   : > { %1460 = vpow2.f32 %v1148_v33  ;;  %v1136_v35 = vsub.f32 0.0, %v2262_v22  ;;  %v1137_v56 = vsub.f32 0.0, %v2264_v51  ;;  %v1028_v28 = vmul.f32 %v1893_v5, %v1010_v8  ;;  %v1128_v38 = vpop.permute.xlu1 %1127 }
 0x1bf   : > { %v1104_v49 = vpop.permute.xlu0 %1103  ;;  %v980_v48 = vadd.f32 %v974_v20, %v927_v60  ;;  %v981_v13 = vadd.f32 %v975_v6, %v928_v34  ;;  %v1482_v60 = vld [vmem:[%s1740_s11] sm:$0xff]  ;;  %s1256_s11 = scalar_lea.sflag [#allocation3], %s350_s28 }
 0x1c0   : > { %v1142_v29 = vmul.f32 1.442695, %v1136_v35  ;;  %v1144_v17 = vmul.f32 1.442695, %v1137_v56  ;;  %v1246_v34 = vcombine.high %v1482_v60, %v1482_v60 }
 0x1c1   : > { %v1033_v45 = vadd.f32 %v1027_v24, %v980_v48  ;;  %v1034_v3 = vadd.f32 %v1028_v28, %v981_v13 }
 0x1c2   : > { %1462 = vpow2.f32 %v1142_v29  ;;  %v1242_v29 = vpop.permute.xlu1 %1241 }
 0x1c3   : > { %1464 = vpow2.f32 %v1144_v17  ;;  %v1046_v23 = vpop.permute.xlu0 %1045 }
 0x1c4   : > { %v1050_v26 = vsel %vm1047_vm15, %v1040_v2, %v1046_v23  ;;  %v1053_v0 = vsel %vm1047_vm15, %v1046_v23, %v1040_v2 }
 0x1c5   : > { %v1062_v10 = vsel %vm1969_vm6, %v1050_v26, 0.0  ;;  %v1063_v16 = vsel %vm2199_vm1, %v1053_v0, 0.0 }
 0x1c6   : > { %v1080_v5 = vmul.f32 %v2113_v52, %v1062_v10  ;;  %v1081_v39 = vmul.f32 %v2113_v52, %v1063_v16 }
 0x1c7   : > { %v1459_v37 = vpop.eup %1458  ;;  %v1234_v8 = vpop.permute.xlu0 %1233 }
 0x1c8   : > { %v1461_v42 = vpop.eup %1460  ;;  %v1086_v58 = vadd.f32 %v1080_v5, %v1033_v45  ;;  %v1087_v57 = vadd.f32 %v1081_v39, %v1034_v3  ;;  %v1156_v15 = vadd.f32 1.0, %v1459_v37 }
 0x1c9   : > { %v1157_v4 = vadd.f32 1.0, %v1461_v42 }
 0x1ca   : > { %v1110_v62 = vmul.f32 %v1104_v49, %v1086_v58  ;;  %v1111_v40 = vmul.f32 %v1104_v49, %v1087_v57  ;;  %1466 = vrcp.f32 %v1156_v15 }
 0x1cb   : > { %1468 = vrcp.f32 %v1157_v4 }
 0x1cc   : > { %v1463_v12 = vpop.eup %1462  ;;  %v1135_v43 = vadd.f32 %v1128_v38, %v1111_v40  ;;  %v1134_v1 = vadd.f32 %v1128_v38, %v1110_v62 }
 0x1cd   : > { %v1465_v53 = vpop.eup %1464  ;;  %v1154_v59 = vadd.f32 1.0, %v1463_v12 }
 0x1ce   : > { %v1155_v54 = vadd.f32 1.0, %v1465_v53  ;;  %v1141_v9 = vsub.f32 0.0, %v1135_v43  ;;  %v1140_v36 = vsub.f32 0.0, %v1134_v1 }
 0x1cf   : > { %1470 = vrcp.f32 %v1154_v59 }
 0x1d0   : > { %1472 = vrcp.f32 %v1155_v54  ;;  %v1152_v52 = vmul.f32 1.442695, %v1141_v9  ;;  %v1150_v61 = vmul.f32 1.442695, %v1140_v36 }
 0x1d2   : > { %1474 = vpow2.f32 %v1152_v52 }
 0x1d3   : > { %1476 = vpow2.f32 %v1150_v61 }
 0x1d4   : > { %v1467_v18 = vpop.eup %1466 }
 0x1d5   : > { %v1469_v27 = vpop.eup %1468  ;;  %v1168_v32 = vmul.f32 %v1467_v18, %v2238_v14 }
 0x1d6   : > { %v1169_v46 = vmul.f32 %v1469_v27, %v2240_v21  ;;  %v1172_v21 = vld [vmem:[%s2358_s7] sm:$0xf] }
 0x1d7   : > { %v1173_v19 = vpack.c.bf16 %v1172_v21, %v1172_v21 }
 0x1d9   : > { %v1471_v44 = vpop.eup %1470 }
 0x1da   : > { %v1473_v25 = vpop.eup %1472  ;;  %v1166_v55 = vmul.f32 %v1471_v44, %v2262_v22 }
 0x1db   : > { %v1167_v7 = vmul.f32 %v1473_v25, %v2264_v51 }
 0x1dc   : > { %v1475_v33 = vpop.eup %1474  ;;  %v1174_v47 = vpack.c.bf16 %v1168_v32, %v1166_v55 }
 0x1dd   : > { %v1477_v30 = vpop.eup %1476  ;;  %v1159_v31 = vadd.f32 1.0, %v1475_v33  ;;  %v1175_v50 = vpack.c.bf16 %v1169_v46, %v1167_v7 }
 0x1de   : > { %v1158_v63 = vadd.f32 1.0, %v1477_v30 }
 0x1df   : > { %1478 = vrcp.f32 %v1159_v31  ;;  %1189 = vmatprep.subr.bf16.mxu0 %v1175_v50 }
 0x1e0   : > { %1190 = vmatpush1.bf16.msra.mxu0 %v1174_v47  ;;  %1480 = vrcp.f32 %v1158_v63 }
 0x1e9   : > { %v1479_v11 = vpop.eup %1478 }
 0x1ea   : > { %v1481_v41 = vpop.eup %1480  ;;  %v1171_v22 = vmul.f32 %v1479_v11, %v1135_v43 }
 0x1eb   : > { %v1170_v14 = vmul.f32 %v1481_v41, %v1134_v1 }
 0x1ec   : > { %v1177_v35 = vpack.c.bf16 %v1171_v22, %v1171_v22 }
 0x1ed   : > { %v1176_v51 = vpack.c.bf16 %v1170_v14, %v1170_v14 }
 0x1ee   : > { %1336 = vmatprep.subr.msk.bf16.mxu0 %vm1182_vm2, %v1177_v35 }
 0x1ef   : > { %v1184_v56 = vsel %vm1182_vm2, %v1176_v51, 0 }
 0x1f0   : > { %1192 = vmatpush1.bf16.msra.mxu0 %v1184_v56 }
 0x1f3   : > { %1337 = vmatmul.mubr.msk.bf16.vlgmr.msra.gmra.mrb[0].mxu0 %vm1178_vm3, %v1173_v19 }
 0x2c6   : > { %v1223_v49 = vpop.f32.mrb[0].mxu0 }
 0x2c7   : > { %v1236_v20 = vmul.f32 %v1234_v8, %v1223_v49  ;;  %v1225_v6 = vpop.f32.mrb[1].mxu0 }
 0x2c8   : > { %v1237_v17 = vmul.f32 %v1234_v8, %v1225_v6  ;;  %v1227_v24 = vpop.f32.mrb[2].mxu0 }
 0x2c9   : > { %v1244_v28 = vadd.f32 %v1242_v29, %v1236_v20  ;;  %v1228_v2 = vpop.f32.mrb[3].mxu0 }
 0x2ca   : > { %v1245_v23 = vadd.f32 %v1242_v29, %v1237_v17 }
 0x2cb   : > { %v1248_v48 = vadd.f32 %v1482_v60, %v1244_v28 }
 0x2cc   : > { %v1249_v13 = vadd.f32 %v1246_v34, %v1245_v23 }
 0x2ce   : > { %v1252_v26 = vcombine.low %v1248_v48, %v1249_v13 }
 0x2d0   : > { %1254 = vst [vmem:[%s352_s12] sm:$0xff] %v1252_v26 }
 0x2d1   : > { %1496 = shalt.err (!%p1493_p3)
}
 0x2d2   : > { %s1497_s28 = scalar_lea.hbm %s2309_s25, 128  ;;  %s1501_s21 = scalar_lea.hbm %s2361_s10, 256 }
 0x2d3   : > { %p1498_p4 = scmp.ne.s32.totalorder %s2309_s25, %s1497_s28  ;;  %p1502_p9 = scmp.lt.u32.totalorder %s2309_s25, %s2361_s10 }
 0x2d4   : > { %p1503_p10 = scmp.lt.u32.totalorder %s1501_s21, %s1497_s28  ;;  %p1505_p12 = scmp.lt.u32.totalorder %s1497_s28, %s2309_s25 }
 0x2d5   : > { %p1499_p7 = pnand %p1498_p4, %p1658_p5 }
 0x2d6   : > { %p1504_p11 = por %p1503_p10, %p1502_p9 }
 0x2d7   : > { %p1500_p8 = pneg %p1499_p7 }
 0x2d8   : > { %p1506_p13 = por %p1505_p12, %p1504_p11 }
 0x2da   : > { %p1507_p0 = pnand %p1506_p13, %p1500_p8 }
 0x2dc   : > { %1510 = shalt.err (!%p1507_p0)
}
 0x2dd   : > { %1345 = dma.vmem_to_hbm [thread:$0]  (%p1658_p5), %s2311_s20, 128, %s2309_s25, %s1256_s11  }
 0x2de PF: > { %p1351_p1 = scmp.ge.s32.totalorder %s1545_s16, 2  ;;  %s1282_s18 = sand.u32 1, %s1533_s13  }
 0x2df   : > { %s1283_s26 = scalar_lea.sflag [#allocation3], %s1282_s18 }
 0x2e0   : > { %p1348_p2 = pnand %p1351_p1, %p1662_p6 }
 0x2e2   : > { %1528 = dma.done.wait (!%p1348_p2), %s1283_s26, 128  }
 0x2e3   : > { %1530 = vsyncadd (!%p1348_p2), %s1283_s26, 4294967168  ;;  %p20_p3 = scmp.ge.s32.totalorder %s1645_s19, 4   ;;  %s2380_s13 = smov %s1537_s14 }
 0x2e4   : > { %s2381_s14 = smov %s1541_s15  ;;  %s2382_s15 = smov %s1656_s22 }
 0x2e5   : > { %s2383_s16 = smov %s1645_s19  ;;  %22 = sbr.rel (!%p20_p3) target bundleno = 3 (0x3), region = 95 }
 0x2ec   :  { %1288 = vsyncpa [#allocation3], 1 }
 0x2ed   :  { %1290 = vsyncpa [#allocation3 + $0x1], 1 }

</bundles_post_ra>
